<compile_context>
chip_gen: v7x
topology: tpu7x:2x2x1
jax: 0.10.0
libtpu: 0.0.40
codegen_flags: <defaults>
</compile_context>

<pallas_src>
import functools
import math

import jax
import jax.numpy as jnp
from jax.experimental import pallas as pl
from jax.experimental.pallas import tpu as pltpu


_NEG_INF = -1e30  # large finite negative (NaN-safe vs -inf)


# ----------------------------- model config ---------------------------------
class ModelArgs:
    def __init__(self, hidden_dim=32, n_layers=2, vocab_size=32, pad_idx=0,
                 max_seq_len=32, norm_eps=1e-5, rope_theta=500000.0,
                 n_heads=4, n_kv_heads=2):
        self.hidden_dim = hidden_dim
        self.n_layers = n_layers
        self.vocab_size = vocab_size
        self.pad_idx = pad_idx
        self.max_seq_len = max_seq_len
        self.norm_eps = norm_eps
        self.rope_theta = rope_theta
        self.n_heads = n_heads
        self.n_kv_heads = n_kv_heads if n_kv_heads is not None else n_heads
        assert self.n_heads % self.n_kv_heads == 0
        assert self.hidden_dim % self.n_heads == 0
        assert (self.hidden_dim // self.n_heads) % 2 == 0


# ------------------------------ helpers (in-kernel) ---------------------------
def _rmsnorm(x, w, eps):
    ms = jnp.mean(x * x, axis=-1, keepdims=True)
    return x * jax.lax.rsqrt(ms + eps) * w


def _rotate_pairs(x, even_mask, use_roll, swap):
    """rot(x)[..., 2j] = -x[..., 2j+1]; rot(x)[..., 2j+1] = x[..., 2j]."""
    e = x.shape[-1]
    if use_roll:
        left = pltpu.roll(x, e - 1, x.ndim - 1)    # left[i]  = x[(i+1) % e]
        right = pltpu.roll(x, 1, x.ndim - 1)       # right[i] = x[(i-1) % e]
        return jnp.where(even_mask, -left, right)
    # Fallback: tiny (hd, hd) block-swap matmul (built once, hoisted by caller).
    return jnp.dot(x, swap, preferred_element_type=jnp.float32)


# ------------------------------ capability probes -----------------------------
@functools.lru_cache(maxsize=1)
def _roll_pairs_supported():
    """Probe (and numerically verify) pltpu.roll on a small unaligned tile."""
    try:
        x = jnp.arange(64, dtype=jnp.float32).reshape(8, 8)

        def kern(x_ref, o_ref):
            o_ref[...] = pltpu.roll(x_ref[...], 1, 1)

        y = pl.pallas_call(
            kern, out_shape=jax.ShapeDtypeStruct((8, 8), jnp.float32))(x)
        return bool(jnp.allclose(jax.block_until_ready(y),
                                 jnp.roll(x, 1, axis=1)))
    except Exception:
        return False


@functools.lru_cache(maxsize=1)
def _buffered_one_supported():
    """Probe pl.Buffered(1) single-buffering for grid-constant blocks."""
    try:
        x = jnp.ones((8, 128), jnp.float32)

        def kern(x_ref, o_ref):
            o_ref[...] = x_ref[...] + 1.0

        y = pl.pallas_call(
            kern,
            out_shape=jax.ShapeDtypeStruct((8, 128), jnp.float32),
            grid_spec=pltpu.PrefetchScalarGridSpec(
                num_scalar_prefetch=0, grid=(2,),
                in_specs=[pl.BlockSpec((8, 128), lambda i: (0, 0),
                                       pipeline_mode=pl.Buffered(1))],
                out_specs=pl.BlockSpec((8, 128), lambda i: (0, 0))),
        )(x)
        return bool(jnp.allclose(jax.block_until_ready(y), x + 1.0))
    except Exception:
        return False


@functools.lru_cache(maxsize=1)
def _vmem_limit_bytes():
    """~3/4 of physical VMEM (96 MiB on v5e/v6e, 48 MiB on v7x), capped."""
    try:
        cap = int(pltpu.get_tpu_info().vmem_capacity_bytes)
    except Exception:
        cap = 64 * 1024 * 1024
    return min(int(cap * 3 // 4), 112 * 1024 * 1024)


def _pick_q_tile(L):
    if L <= 128:
        return L
    for t in (256, 128):
        if L % t == 0:
            return t
    return L


def _pick_vocab_tile(V):
    if V <= 2048:
        return V
    for t in (2048, 1024, 512, 256, 128):
        if V % t == 0:
            return t
    return V


# ------------------------------ kernels --------------------------------------
def fused_layers_kernel(
    emb_ref, attn_nw_ref, wq_ref, wk_ref, wv_ref, wo_ref,
    mlp_nw_ref, w1_ref, w3_ref, w2_ref, cos_ref, sin_ref,
    out_ref,
    *, n_heads, n_kv_heads, head_dim, norm_eps, use_roll, q_tile):
    """One grid step = one (batch row, layer). Last layer's write persists."""
    H, KV, hd = n_heads, n_kv_heads, head_dim
    n_rep = H // KV
    L = emb_ref.shape[1]
    tq = q_tile
    n_qt = L // tq
    scale = 1.0 / math.sqrt(hd)

    # ---- per-(batch,layer) work: full-sequence K/V projection + RoPE --------
    x_full = emb_ref[0]                                       # (L, D) f32
    xb_full = _rmsnorm(x_full, attn_nw_ref[0], norm_eps).astype(jnp.bfloat16)
    k = jnp.dot(xb_full, wk_ref[0], preferred_element_type=jnp.float32)  # (L, KV*hd)
    v = jnp.dot(xb_full, wv_ref[0], preferred_element_type=jnp.float32)  # (L, KV*hd)

    cos = cos_ref[...]                                        # (L, hd) f32
    sin = sin_ref[...]

    # Hoisted rotary parity masks / swap fallback (review: don't rebuild per group).
    even_L = jax.lax.broadcasted_iota(jnp.int32, (L, hd), 1) % 2 == 0
    even_q = jax.lax.broadcasted_iota(jnp.int32, (n_rep * tq, hd), 1) % 2 == 0
    swap = None
    if not use_roll:
        r = jax.lax.broadcasted_iota(jnp.int32, (hd, hd), 0)
        c = jax.lax.broadcasted_iota(jnp.int32, (hd, hd), 1)
        swap = jnp.where((c == r + 1) & (r % 2 == 0), 1.0,
                         jnp.where((c == r - 1) & (r % 2 == 1), -1.0, 0.0)
                         ).astype(jnp.float32)

    k_groups, v_groups = [], []
    for g in range(KV):
        kg = k[:, g * hd:(g + 1) * hd]                        # (L, hd)
        kg = kg * cos + _rotate_pairs(kg, even_L, use_roll, swap) * sin
        k_groups.append(kg.astype(jnp.bfloat16))
        v_groups.append(v[:, g * hd:(g + 1) * hd].astype(jnp.bfloat16))

    # Hoisted causal-bias iota templates (per q-tile only the offset changes).
    kpos = jax.lax.broadcasted_iota(jnp.int32, (tq, L), 1)
    qrow = jax.lax.broadcasted_iota(jnp.int32, (tq, L), 0)

    # ---- query-tile body: scores live as a bounded (n_rep*tq, L) slab -------
    def q_tile_body(qt):
        if isinstance(qt, int):
            q0 = qt * tq
        else:
            q0 = pl.multiple_of(qt * tq, tq)

        x_q = emb_ref[0, pl.ds(q0, tq), :]                    # (tq, D)
        xb_q = _rmsnorm(x_q, attn_nw_ref[0], norm_eps).astype(jnp.bfloat16)
        q = jnp.dot(xb_q, wq_ref[0], preferred_element_type=jnp.float32)  # (tq, H*hd)

        cos_q = cos_ref[pl.ds(q0, tq), :]
        sin_q = sin_ref[pl.ds(q0, tq), :]
        if n_rep > 1:
            cos_g = jnp.concatenate([cos_q] * n_rep, axis=0)  # (n_rep*tq, hd)
            sin_g = jnp.concatenate([sin_q] * n_rep, axis=0)
        else:
            cos_g, sin_g = cos_q, sin_q

        bias_t = jnp.where(kpos > qrow + q0,
                           jnp.float32(_NEG_INF), jnp.float32(0.0))        # (tq, L)
        bias = jnp.concatenate([bias_t] * n_rep, axis=0) if n_rep > 1 else bias_t

        head_blocks = [None] * H
        for g in range(KV):
            if n_rep > 1:
                qg = jnp.concatenate(
                    [q[:, (g * n_rep + r) * hd:(g * n_rep + r + 1) * hd]
                     for r in range(n_rep)], axis=0)          # (n_rep*tq, hd)
            else:
                qg = q[:, g * hd:(g + 1) * hd]
            qg = qg * cos_g + _rotate_pairs(qg, even_q, use_roll, swap) * sin_g

            s = jax.lax.dot_general(
                qg.astype(jnp.bfloat16), k_groups[g],
                (((1,), (1,)), ((), ())),
                preferred_element_type=jnp.float32) * scale + bias   # (n_rep*tq, L)
            m = jnp.max(s, axis=-1, keepdims=True)
            e = jnp.exp(s - m)
            p = e * pl.reciprocal(jnp.sum(e, axis=-1, keepdims=True), approx=True)
            og = jnp.dot(p.astype(jnp.bfloat16), v_groups[g],
                         preferred_element_type=jnp.float32)         # (n_rep*tq, hd)
            for r in range(n_rep):
                head_blocks[g * n_rep + r] = og[r * tq:(r + 1) * tq, :]

        # Single fused output projection: (tq, H*hd) x (H*hd, D) on the MXU.
        attn_cat = jnp.concatenate(head_blocks, axis=1).astype(jnp.bfloat16)
        h1 = x_q + jnp.dot(attn_cat, wo_ref[0], preferred_element_type=jnp.float32)

        # --- SwiGLU MLP (bf16 matmuls, f32 elementwise) ---
        hb = _rmsnorm(h1, mlp_nw_ref[0], norm_eps).astype(jnp.bfloat16)
        g1 = jnp.dot(hb, w1_ref[0], preferred_element_type=jnp.float32)
        u = jnp.dot(hb, w3_ref[0], preferred_element_type=jnp.float32)
        act = (g1 * jax.nn.sigmoid(g1) * u).astype(jnp.bfloat16)
        out_ref[0, pl.ds(q0, tq), :] = h1 + jnp.dot(
            act, w2_ref[0], preferred_element_type=jnp.float32)

    if n_qt == 1:
        q_tile_body(0)
    else:
        pl.loop(0, n_qt)(q_tile_body)


def lm_head_kernel(h_ref, nw_ref, wlm_ref, out_ref, xn_ref, *, eps):
    # RMSNorm + bf16 cast computed ONCE per batch row (vocab axis is inner).
    @pl.when(pl.program_id(1) == 0)
    def _():
        xn_ref[...] = _rmsnorm(h_ref[0], nw_ref[...], eps).astype(jnp.bfloat16)
    out_ref[0] = jnp.dot(xn_ref[...], wlm_ref[...],
                         preferred_element_type=jnp.float32)


# ----------------------------- pallas wrappers --------------------------------
def run_layers(emb, layers, cos_t, sin_t, args, use_roll, single_buf, q_tile):
    B, L, D = emb.shape
    NL = layers['wq'].shape[0]
    H, KV = args.n_heads, args.n_kv_heads
    hd = D // H

    weight_names = ['attn_norm', 'wq', 'wk', 'wv', 'wo',
                    'mlp_norm', 'w1', 'w3', 'w2']
    weights = [layers[n] for n in weight_names]

    def layer_spec(arr):
        nd = arr.ndim
        blk = (1,) + arr.shape[1:]
        return pl.BlockSpec(blk, lambda b, l, _nd=nd: (l,) + (0,) * (_nd - 1))

    def const_spec(arr):
        nd = arr.ndim
        if single_buf:
            # Grid-constant table: single-buffer to halve its VMEM footprint.
            return pl.BlockSpec(arr.shape, lambda b, l, _nd=nd: (0,) * _nd,
                                pipeline_mode=pl.Buffered(1))
        return pl.BlockSpec(arr.shape, lambda b, l, _nd=nd: (0,) * _nd)

    kernel = functools.partial(fused_layers_kernel,
                               n_heads=H, n_kv_heads=KV, head_dim=hd,
                               norm_eps=args.norm_eps, use_roll=use_roll,
                               q_tile=q_tile)

    in_specs = [pl.BlockSpec((1, L, D), lambda b, l: (b, 0, 0))]
    in_specs += [layer_spec(w) for w in weights]
    in_specs += [const_spec(cos_t), const_spec(sin_t)]

    return pl.pallas_call(
        kernel,
        out_shape=jax.ShapeDtypeStruct((B, L, D), jnp.float32),
        grid_spec=pltpu.PrefetchScalarGridSpec(
            num_scalar_prefetch=0,
            grid=(B, NL),                     # layer axis inner: weights stream/prefetch
            in_specs=in_specs,
            out_specs=pl.BlockSpec((1, L, D), lambda b, l: (b, 0, 0))),
        compiler_params=pltpu.CompilerParams(
            dimension_semantics=("parallel", "arbitrary"),
            vmem_limit_bytes=_vmem_limit_bytes()),
    )(emb, *weights, cos_t, sin_t)


def run_lm_head(hidden, norm_w, lm_w, *, eps=1e-6):
    B, L, D = hidden.shape
    V = lm_w.shape[1]
    tn = _pick_vocab_tile(V)
    nv = V // tn
    kernel = functools.partial(lm_head_kernel, eps=eps)
    return pl.pallas_call(
        kernel,
        out_shape=jax.ShapeDtypeStruct((B, L, V), jnp.float32),
        grid_spec=pltpu.PrefetchScalarGridSpec(
            num_scalar_prefetch=0,
            grid=(B, nv),
            in_specs=[pl.BlockSpec((1, L, D), lambda b, j: (b, 0, 0)),
                      pl.BlockSpec((1, D), lambda b, j: (0, 0)),
                      pl.BlockSpec((D, tn), lambda b, j: (0, j))],
            out_specs=pl.BlockSpec((1, L, tn), lambda b, j: (b, 0, j)),
            scratch_shapes=[pltpu.VMEM((L, D), jnp.bfloat16)]),
        compiler_params=pltpu.CompilerParams(
            dimension_semantics=("parallel", "arbitrary"),
            vmem_limit_bytes=_vmem_limit_bytes()),
    )(hidden, norm_w, lm_w)


# --------------------------- host-side helpers --------------------------------
def rope_tables(L, head_dim, theta, start_pos=0):
    freqs = 1.0 / (theta ** (jnp.arange(0, head_dim, 2, dtype=jnp.float32)
                             [: head_dim // 2] / head_dim))
    t = jnp.arange(start_pos, start_pos + L, dtype=jnp.float32)
    ang = jnp.outer(t, freqs)                                # (L, hd/2)
    cos_h, sin_h = jnp.cos(ang), jnp.sin(ang)
    cos_full = jnp.repeat(cos_h, 2, axis=1)                  # (L, hd) interleaved pairs
    sin_full = jnp.repeat(sin_h, 2, axis=1)
    return cos_h, sin_h, cos_full, sin_full


def init_params(key, args):
    D, V = args.hidden_dim, args.vocab_size
    H, KV = args.n_heads, args.n_kv_heads
    hd = D // H
    inter = 4 * D
    keys = jax.random.split(key, 3 + args.n_layers)
    emb = jax.random.normal(keys[0], (V, D), jnp.float32) * 0.02
    emb = emb.at[args.pad_idx].set(0.0)                      # nn.Embedding padding_idx
    lm_head = (jax.random.normal(keys[1], (D, V), jnp.float32) * 0.05
               ).astype(jnp.bfloat16)
    final_norm = 1.0 + 0.1 * jax.random.normal(keys[2], (1, D), jnp.float32)

    def one_layer(k):
        ks = jax.random.split(k, 9)
        return dict(
            attn_norm=1.0 + 0.1 * jax.random.normal(ks[7], (1, D), jnp.float32),
            mlp_norm=1.0 + 0.1 * jax.random.normal(ks[8], (1, D), jnp.float32),
            wq=(jax.random.normal(ks[0], (D, H * hd), jnp.float32) * 0.05).astype(jnp.bfloat16),
            wk=(jax.random.normal(ks[1], (D, KV * hd), jnp.float32) * 0.05).astype(jnp.bfloat16),
            wv=(jax.random.normal(ks[2], (D, KV * hd), jnp.float32) * 0.05).astype(jnp.bfloat16),
            wo=(jax.random.normal(ks[3], (H * hd, D), jnp.float32) * 0.05).astype(jnp.bfloat16),
            w1=(jax.random.normal(ks[4], (D, inter), jnp.float32) * 0.05).astype(jnp.bfloat16),
            w3=(jax.random.normal(ks[5], (D, inter), jnp.float32) * 0.05).astype(jnp.bfloat16),
            w2=(jax.random.normal(ks[6], (inter, D), jnp.float32) * 0.05).astype(jnp.bfloat16),
        )

    per_layer = [one_layer(keys[3 + i]) for i in range(args.n_layers)]
    # Stack per-layer weights along a leading n_layers axis (layer grid axis).
    layers = {name: jnp.stack([lp[name] for lp in per_layer], axis=0)
              for name in per_layer[0]}
    return dict(emb=emb, lm_head=lm_head, norm=final_norm, layers=layers)


def transformer_forward(tokens, params, args, use_roll=True, single_buf=False,
                        q_tile=None, start_pos=0):
    assert start_pos == 0  # TODO(synk): decode path with persistent KV cache
    B, L = tokens.shape
    D, H = args.hidden_dim, args.n_heads
    hd = D // H
    emb = jnp.take(params['emb'], tokens, axis=0)            # (B, L, D) f32
    _, _, cos_t, sin_t = rope_tables(L, hd, args.rope_theta, start_pos)
    if q_tile is None:
        q_tile = _pick_q_tile(L)
    assert L % q_tile == 0
    # NOTE: matches the reference exactly — every layer consumes `emb`; all
    # layers execute inside one pallas_call, last layer's output persists.
    hidden = run_layers(emb, params['layers'], cos_t, sin_t, args,
                        use_roll, single_buf, q_tile)
    logits = run_lm_head(hidden, params['norm'], params['lm_head'], eps=1e-6)
    return logits, None


# ------------------------- pure-JAX reference (check) --------------------------
def reference_forward(tokens, params, args):
    B, L = tokens.shape
    D, H, KV = args.hidden_dim, args.n_heads, args.n_kv_heads
    hd, n_rep = D // H, H // KV
    cos_h, sin_h, _, _ = rope_tables(L, hd, args.rope_theta, 0)
    mask = jnp.where(jnp.arange(L)[None, :] > jnp.arange(L)[:, None],
                     -jnp.inf, 0.0).astype(jnp.float32)
    x = jnp.take(params['emb'], tokens, axis=0)

    def bdot(a, b):
        return jnp.dot(a.astype(jnp.bfloat16), b.astype(jnp.bfloat16),
                       preferred_element_type=jnp.float32)

    def rms(v, w, eps):
        return v * jax.lax.rsqrt(jnp.mean(v * v, -1, keepdims=True) + eps) * w

    def rope(t, n):
        tr = t.reshape(B, L, n, hd // 2, 2)
        te, to = tr[..., 0], tr[..., 1]
        c = cos_h[None, :, None, :]
        s = sin_h[None, :, None, :]
        out = jnp.stack([te * c - to * s, te * s + to * c], axis=-1)
        return out.reshape(B, L, n * hd)

    NL = params['layers']['wq'].shape[0]
    hidden = x
    for i in range(NL):
        lp = {k: v[i] for k, v in params['layers'].items()}
        xn = rms(x, lp['attn_norm'], args.norm_eps)
        q, k, v = bdot(xn, lp['wq']), bdot(xn, lp['wk']), bdot(xn, lp['wv'])
        q, k = rope(q, H), rope(k, KV)
        qh = q.reshape(B, L, H, hd).transpose(0, 2, 1, 3)
        kh = jnp.repeat(k.reshape(B, L, KV, hd), n_rep, axis=2).transpose(0, 2, 1, 3)
        vh = jnp.repeat(v.reshape(B, L, KV, hd), n_rep, axis=2).transpose(0, 2, 1, 3)
        s = jnp.einsum('bhqd,bhkd->bhqk', qh.astype(jnp.bfloat16),
                       kh.astype(jnp.bfloat16),
                       preferred_element_type=jnp.float32) / math.sqrt(hd) + mask
        p = jax.nn.softmax(s, axis=-1)
        o = jnp.einsum('bhqk,bhkd->bhqd', p.astype(jnp.bfloat16),
                       vh.astype(jnp.bfloat16),
                       preferred_element_type=jnp.float32)
        o = o.transpose(0, 2, 1, 3).reshape(B, L, H * hd)
        h1 = x + bdot(o, lp['wo'])
        hn = rms(h1, lp['mlp_norm'], args.norm_eps)
        hidden = h1 + bdot(jax.nn.silu(bdot(hn, lp['w1'])) * bdot(hn, lp['w3']),
                           lp['w2'])
    hn = rms(hidden, params['norm'], 1e-6)
    return bdot(hn, params['lm_head'])


# ----------------------------------- main --------------------------------------
if __name__ == "__main__":
    args = ModelArgs(hidden_dim=32, n_layers=2, vocab_size=32, pad_idx=0,
                     max_seq_len=32, norm_eps=1e-5, rope_theta=500000.0,
                     n_heads=4, n_kv_heads=2)
    key = jax.random.PRNGKey(0)
    pkey, tkey, tkey2 = jax.random.split(key, 3)
    params = init_params(pkey, args)

    # Capability probes (run eagerly, before any jit tracing).
    use_roll = _roll_pairs_supported()
    single_buf = _buffered_one_supported()

    # --- primary check: B=2, L=8 (single query tile; both layers in one call) ---
    B, L = 2, 8
    tokens = jax.random.randint(tkey, (B, L), 0, args.vocab_size, dtype=jnp.int32)
    fwd = jax.jit(functools.partial(transformer_forward, args=args,
                                    use_roll=use_roll, single_buf=single_buf))
    logits, _ = fwd(tokens, params)
    logits = jax.block_until_ready(logits)
    ref = jax.block_until_ready(reference_forward(tokens, params, args))
    assert logits.shape == (B, L, args.vocab_size)
    err = float(jnp.max(jnp.abs(logits - ref)))
    assert jnp.allclose(logits, ref, atol=3e-2, rtol=3e-2), f"max abs diff {err}"

    # --- secondary check: B=1, L=16, q_tile=8 -> exercises the in-kernel
    #     query-tile loop (bounded score slab) and the B=1 path. ---
    fwd2 = jax.jit(functools.partial(transformer_forward, args=args,
                                     use_roll=use_roll, single_buf=single_buf,
                                     q_tile=8))
    tokens2 = jax.random.randint(tkey2, (1, 16), 0, args.vocab_size,
                                 dtype=jnp.int32)
    logits2, _ = fwd2(tokens2, params)
    logits2 = jax.block_until_ready(logits2)
    ref2 = jax.block_until_ready(reference_forward(tokens2, params, args))
    err2 = float(jnp.max(jnp.abs(logits2 - ref2)))
    assert jnp.allclose(logits2, ref2, atol=3e-2, rtol=3e-2), f"max abs diff {err2}"

    print("KERNEL_OK")
</pallas_src>

<mosaic_0001>
module attributes {stable_mosaic.version = 11 : i64} {
  func.func @kern(%arg0: memref<8x8xf32, #tpu.memory_space<vmem>>, %arg1: memref<8x8xf32, #tpu.memory_space<vmem>>) attributes {dimension_semantics = [], scalar_prefetch = 0 : i64, scratch_operands = 0 : i64, tpu.core_type = #tpu.core_type<tc>} {
    %c0 = arith.constant 0 : index
    %c0_0 = arith.constant 0 : index
    %0 = vector.load %arg0[%c0, %c0_0] : memref<8x8xf32, #tpu.memory_space<vmem>>, vector<8x8xf32>
    %c1_i32 = arith.constant 1 : i32
    %1 = tpu.dynamic_rotate %0 by %c1_i32 dim 1 : vector<8x8xf32>, i32 -> vector<8x8xf32>
    %c0_1 = arith.constant 0 : index
    %c0_2 = arith.constant 0 : index
    %2 = vector.load %arg1[%c0_1, %c0_2] : memref<8x8xf32, #tpu.memory_space<vmem>>, vector<8x8xf32>
    tpu.vector_store %arg1[%c0_1, %c0_2], %1 {strides = array<i32>} : memref<8x8xf32, #tpu.memory_space<vmem>>, vector<8x8xf32>,
    return
  }
}

module attributes {stable_mosaic.version = 11 : i64} {
  func.func @kern(%arg0: i32, %arg1: memref<8x128xf32, #tpu.memory_space<vmem>>, %arg2: memref<8x128xf32, #tpu.memory_space<vmem>>) attributes {dimension_semantics = [#tpu.dimension_semantics<arbitrary>], iteration_bounds = array<i64: 2>, scalar_prefetch = 0 : i64, scratch_operands = 0 : i64, tpu.core_type = #tpu.core_type<tc>, window_params = [{pipeline_mode = #tpu.pipeline_mode<synchronous>, transform_indices = @transform_0, window_bounds = array<i64: 8, 128>}, {pipeline_mode = #tpu.pipeline_mode<synchronous>, transform_indices = @transform_1, window_bounds = array<i64: 8, 128>}]} {
    %c0 = arith.constant 0 : index
    %c0_0 = arith.constant 0 : index
    %0 = vector.load %arg1[%c0, %c0_0] : memref<8x128xf32, #tpu.memory_space<vmem>>, vector<8x128xf32>
    %cst = arith.constant 1.000000e+00 : f32
    %1 = vector.broadcast %cst : f32 to vector<8x128xf32>
    %2 = arith.addf %0, %1 : vector<8x128xf32>
    %c0_1 = arith.constant 0 : index
    %c0_2 = arith.constant 0 : index
    %3 = vector.load %arg2[%c0_1, %c0_2] : memref<8x128xf32, #tpu.memory_space<vmem>>, vector<8x128xf32>
    tpu.vector_store %arg2[%c0_1, %c0_2], %2 {strides = array<i32>} : memref<8x128xf32, #tpu.memory_space<vmem>>, vector<8x128xf32>,
    return
  }
  func.func @transform_0(%arg0: i32) -> (i32, i32) {
    %c0_i32 = arith.constant 0 : i32
    %c0_i32_0 = arith.constant 0 : i32
    %c0_i32_1 = arith.constant 0 : i32
    return %c0_i32, %c0_i32_0 : i32, i32
  }
  func.func @transform_1(%arg0: i32) -> (i32, i32) {
    %c0_i32 = arith.constant 0 : i32
    %c0_i32_0 = arith.constant 0 : i32
    %c0_i32_1 = arith.constant 0 : i32
    return %c0_i32, %c0_i32_0 : i32, i32
  }
}

module attributes {stable_mosaic.version = 11 : i64} {
  func.func @lm_head_kernel(%arg0: i32, %arg1: i32, %arg2: memref<1x8x32xf32, #tpu.memory_space<vmem>>, %arg3: memref<1x32xf32, #tpu.memory_space<vmem>>, %arg4: memref<32x32xbf16, #tpu.memory_space<vmem>>, %arg5: memref<1x8x32xf32, #tpu.memory_space<vmem>>, %arg6: memref<8x32xbf16, #tpu.memory_space<vmem>>) attributes {dimension_semantics = [#tpu.dimension_semantics<parallel>, #tpu.dimension_semantics<arbitrary>], iteration_bounds = array<i64: 2, 1>, scalar_prefetch = 0 : i64, scratch_operands = 1 : i64, tpu.core_type = #tpu.core_type<tc>, window_params = [{transform_indices = @transform_0, window_bounds = array<i64: 1, 8, 32>}, {pipeline_mode = #tpu.pipeline_mode<synchronous>, transform_indices = @transform_1, window_bounds = array<i64: 1, 32>}, {transform_indices = @transform_2, window_bounds = array<i64: 32, 32>}, {transform_indices = @transform_3, window_bounds = array<i64: 1, 8, 32>}]} {
    %c0_i32 = arith.constant 0 : i32
    %0 = arith.cmpi eq, %arg1, %c0_i32 : i32
    %1 = arith.extui %0 : i1 to i32
    %c0_i32_0 = arith.constant 0 : i32
    %2 = arith.cmpi ne, %1, %c0_i32_0 : i32
    scf.if %2 {
      %c0_7 = arith.constant 0 : index
      %c0_8 = arith.constant 0 : index
      %c0_9 = arith.constant 0 : index
      %9 = vector.load %arg2[%c0_7, %c0_8, %c0_9] : memref<1x8x32xf32, #tpu.memory_space<vmem>>, vector<1x8x32xf32>
      %10 = vector.shape_cast %9 : vector<1x8x32xf32> to vector<8x32xf32>
      %c0_10 = arith.constant 0 : index
      %c0_11 = arith.constant 0 : index
      %11 = vector.load %arg3[%c0_10, %c0_11] : memref<1x32xf32, #tpu.memory_space<vmem>>, vector<1x32xf32>
      %12 = arith.mulf %10, %10 : vector<8x32xf32>
      %cst_12 = arith.constant dense<0.000000e+00> : vector<8xf32>
      %13 = vector.multi_reduction <add>, %12, %cst_12 [1] : vector<8x32xf32> to vector<8xf32>
      %14 = vector.shape_cast %13 : vector<8xf32> to vector<8x1xf32>
      %cst_13 = arith.constant 3.200000e+01 : f32
      %15 = vector.broadcast %cst_13 : f32 to vector<8x1xf32>
      %16 = arith.divf %14, %15 : vector<8x1xf32>
      %cst_14 = arith.constant 9.99999997E-7 : f32
      %17 = vector.broadcast %cst_14 : f32 to vector<8x1xf32>
      %18 = arith.addf %16, %17 : vector<8x1xf32>
      %19 = math.rsqrt %18 : vector<8x1xf32>
      %20 = vector.broadcast %19 : vector<8x1xf32> to vector<8x32xf32>
      %21 = arith.mulf %10, %20 : vector<8x32xf32>
      %22 = vector.broadcast %11 : vector<1x32xf32> to vector<8x32xf32>
      %23 = arith.mulf %21, %22 : vector<8x32xf32>
      %24 = arith.truncf %23 : vector<8x32xf32> to vector<8x32xbf16>
      %c0_15 = arith.constant 0 : index
      %c0_16 = arith.constant 0 : index
      %25 = vector.load %arg6[%c0_15, %c0_16] : memref<8x32xbf16, #tpu.memory_space<vmem>>, vector<8x32xbf16>
      tpu.vector_store %arg6[%c0_15, %c0_16], %24 {strides = array<i32>} : memref<8x32xbf16, #tpu.memory_space<vmem>>, vector<8x32xbf16>,
    } else {
    }
    %c0 = arith.constant 0 : index
    %c0_1 = arith.constant 0 : index
    %3 = vector.load %arg6[%c0, %c0_1] : memref<8x32xbf16, #tpu.memory_space<vmem>>, vector<8x32xbf16>
    %c0_2 = arith.constant 0 : index
    %c0_3 = arith.constant 0 : index
    %4 = vector.load %arg4[%c0_2, %c0_3] : memref<32x32xbf16, #tpu.memory_space<vmem>>, vector<32x32xbf16>
    %cst = arith.constant dense<0.000000e+00> : vector<8x32xf32>
    %5 = tpu.matmul %3, %4, %cst {dimension_numbers = #tpu.dot_dimension_numbers<[1], [0], [0], [1], [0, 0, 1, 1], [], []>} : vector<8x32xbf16>, vector<32x32xbf16>, vector<8x32xf32> -> vector<8x32xf32>
    %c0_4 = arith.constant 0 : index
    %c0_5 = arith.constant 0 : index
    %c0_6 = arith.constant 0 : index
    %6 = vector.load %arg5[%c0_4, %c0_5, %c0_6] : memref<1x8x32xf32, #tpu.memory_space<vmem>>, vector<1x8x32xf32>
    %7 = vector.shape_cast %6 : vector<1x8x32xf32> to vector<8x32xf32>
    %8 = vector.shape_cast %5 : vector<8x32xf32> to vector<1x8x32xf32>
    tpu.vector_store %arg5[%c0_4, %c0_5, %c0_6], %8 {strides = array<i32>} : memref<1x8x32xf32, #tpu.memory_space<vmem>>, vector<1x8x32xf32>,
    return
  }
  func.func @transform_0(%arg0: i32, %arg1: i32) -> (i32, i32, i32) {
    %c0_i32 = arith.constant 0 : i32
    %c0_i32_0 = arith.constant 0 : i32
    %c0_i32_1 = arith.constant 0 : i32
    return %arg0, %c0_i32, %c0_i32_0 : i32, i32, i32
  }
  func.func @transform_1(%arg0: i32, %arg1: i32) -> (i32, i32) {
    %c0_i32 = arith.constant 0 : i32
    %c0_i32_0 = arith.constant 0 : i32
    %c0_i32_1 = arith.constant 0 : i32
    return %c0_i32, %c0_i32_0 : i32, i32
  }
  func.func @transform_2(%arg0: i32, %arg1: i32) -> (i32, i32) {
    %c0_i32 = arith.constant 0 : i32
    %c0_i32_0 = arith.constant 0 : i32
    return %c0_i32, %arg1 : i32, i32
  }
  func.func @transform_3(%arg0: i32, %arg1: i32) -> (i32, i32, i32) {
    %c0_i32 = arith.constant 0 : i32
    %c0_i32_0 = arith.constant 0 : i32
    return %arg0, %c0_i32, %arg1 : i32, i32, i32
  }
}

module attributes {stable_mosaic.version = 11 : i64} {
  func.func @fused_layers_kernel(%arg0: i32, %arg1: i32, %arg2: memref<1x8x32xf32, #tpu.memory_space<vmem>>, %arg3: memref<1x1x32xf32, #tpu.memory_space<vmem>>, %arg4: memref<1x32x32xbf16, #tpu.memory_space<vmem>>, %arg5: memref<1x32x16xbf16, #tpu.memory_space<vmem>>, %arg6: memref<1x32x16xbf16, #tpu.memory_space<vmem>>, %arg7: memref<1x32x32xbf16, #tpu.memory_space<vmem>>, %arg8: memref<1x1x32xf32, #tpu.memory_space<vmem>>, %arg9: memref<1x32x128xbf16, #tpu.memory_space<vmem>>, %arg10: memref<1x32x128xbf16, #tpu.memory_space<vmem>>, %arg11: memref<1x128x32xbf16, #tpu.memory_space<vmem>>, %arg12: memref<8x8xf32, #tpu.memory_space<vmem>>, %arg13: memref<8x8xf32, #tpu.memory_space<vmem>>, %arg14: memref<1x8x32xf32, #tpu.memory_space<vmem>>) attributes {dimension_semantics = [#tpu.dimension_semantics<parallel>, #tpu.dimension_semantics<arbitrary>], iteration_bounds = array<i64: 2, 2>, scalar_prefetch = 0 : i64, scratch_operands = 0 : i64, tpu.core_type = #tpu.core_type<tc>, window_params = [{transform_indices = @transform_0, window_bounds = array<i64: 1, 8, 32>}, {transform_indices = @transform_1, window_bounds = array<i64: 1, 1, 32>}, {transform_indices = @transform_2, window_bounds = array<i64: 1, 32, 32>}, {transform_indices = @transform_3, window_bounds = array<i64: 1, 32, 16>}, {transform_indices = @transform_4, window_bounds = array<i64: 1, 32, 16>}, {transform_indices = @transform_5, window_bounds = array<i64: 1, 32, 32>}, {transform_indices = @transform_6, window_bounds = array<i64: 1, 1, 32>}, {transform_indices = @transform_7, window_bounds = array<i64: 1, 32, 128>}, {transform_indices = @transform_8, window_bounds = array<i64: 1, 32, 128>}, {transform_indices = @transform_9, window_bounds = array<i64: 1, 128, 32>}, {pipeline_mode = #tpu.pipeline_mode<synchronous>, transform_indices = @transform_10, window_bounds = array<i64: 8, 8>}, {pipeline_mode = #tpu.pipeline_mode<synchronous>, transform_indices = @transform_11, window_bounds = array<i64: 8, 8>}, {transform_indices = @transform_12, window_bounds = array<i64: 1, 8, 32>}]} {
    %c0 = arith.constant 0 : index
    %c0_0 = arith.constant 0 : index
    %c0_1 = arith.constant 0 : index
    %0 = vector.load %arg2[%c0, %c0_0, %c0_1] : memref<1x8x32xf32, #tpu.memory_space<vmem>>, vector<1x8x32xf32>
    %1 = vector.shape_cast %0 : vector<1x8x32xf32> to vector<8x32xf32>
    %c0_2 = arith.constant 0 : index
    %c0_3 = arith.constant 0 : index
    %c0_4 = arith.constant 0 : index
    %2 = vector.load %arg3[%c0_2, %c0_3, %c0_4] : memref<1x1x32xf32, #tpu.memory_space<vmem>>, vector<1x1x32xf32>
    %3 = vector.shape_cast %2 : vector<1x1x32xf32> to vector<1x32xf32>
    %4 = arith.mulf %1, %1 : vector<8x32xf32>
    %cst = arith.constant dense<0.000000e+00> : vector<8xf32>
    %5 = vector.multi_reduction <add>, %4, %cst [1] : vector<8x32xf32> to vector<8xf32>
    %6 = vector.shape_cast %5 : vector<8xf32> to vector<8x1xf32>
    %cst_5 = arith.constant 3.200000e+01 : f32
    %7 = vector.broadcast %cst_5 : f32 to vector<8x1xf32>
    %8 = arith.divf %6, %7 : vector<8x1xf32>
    %cst_6 = arith.constant 9.99999974E-6 : f32
    %9 = vector.broadcast %cst_6 : f32 to vector<8x1xf32>
    %10 = arith.addf %8, %9 : vector<8x1xf32>
    %11 = math.rsqrt %10 : vector<8x1xf32>
    %12 = vector.broadcast %11 : vector<8x1xf32> to vector<8x32xf32>
    %13 = arith.mulf %1, %12 : vector<8x32xf32>
    %14 = vector.broadcast %3 : vector<1x32xf32> to vector<8x32xf32>
    %15 = arith.mulf %13, %14 : vector<8x32xf32>
    %16 = arith.truncf %15 : vector<8x32xf32> to vector<8x32xbf16>
    %c0_7 = arith.constant 0 : index
    %c0_8 = arith.constant 0 : index
    %c0_9 = arith.constant 0 : index
    %17 = vector.load %arg5[%c0_7, %c0_8, %c0_9] : memref<1x32x16xbf16, #tpu.memory_space<vmem>>, vector<1x32x16xbf16>
    %18 = vector.shape_cast %17 : vector<1x32x16xbf16> to vector<32x16xbf16>
    %cst_10 = arith.constant dense<0.000000e+00> : vector<8x16xf32>
    %19 = tpu.matmul %16, %18, %cst_10 {dimension_numbers = #tpu.dot_dimension_numbers<[1], [0], [0], [1], [0, 0, 1, 1], [], []>} : vector<8x32xbf16>, vector<32x16xbf16>, vector<8x16xf32> -> vector<8x16xf32>
    %c0_11 = arith.constant 0 : index
    %c0_12 = arith.constant 0 : index
    %c0_13 = arith.constant 0 : index
    %20 = vector.load %arg6[%c0_11, %c0_12, %c0_13] : memref<1x32x16xbf16, #tpu.memory_space<vmem>>, vector<1x32x16xbf16>
    %21 = vector.shape_cast %20 : vector<1x32x16xbf16> to vector<32x16xbf16>
    %cst_14 = arith.constant dense<0.000000e+00> : vector<8x16xf32>
    %22 = tpu.matmul %16, %21, %cst_14 {dimension_numbers = #tpu.dot_dimension_numbers<[1], [0], [0], [1], [0, 0, 1, 1], [], []>} : vector<8x32xbf16>, vector<32x16xbf16>, vector<8x16xf32> -> vector<8x16xf32>
    %c0_15 = arith.constant 0 : index
    %c0_16 = arith.constant 0 : index
    %23 = vector.load %arg12[%c0_15, %c0_16] : memref<8x8xf32, #tpu.memory_space<vmem>>, vector<8x8xf32>
    %c0_17 = arith.constant 0 : index
    %c0_18 = arith.constant 0 : index
    %24 = vector.load %arg13[%c0_17, %c0_18] : memref<8x8xf32, #tpu.memory_space<vmem>>, vector<8x8xf32>
    %25 = tpu.iota {dimensions = array<i32: 0>} : vector<8x8xi32>
    %26 = tpu.iota {dimensions = array<i32: 1>} : vector<8x8xi32>
    %c1_i32 = arith.constant 1 : i32
    %27 = vector.broadcast %c1_i32 : i32 to vector<8x8xi32>
    %28 = arith.addi %25, %27 : vector<8x8xi32>
    %29 = arith.cmpi eq, %26, %28 : vector<8x8xi32>
    %c2_i32 = arith.constant 2 : i32
    %c0_i32 = arith.constant 0 : i32
    %30 = arith.cmpi eq, %c2_i32, %c0_i32 : i32
    %c1_i32_19 = arith.constant 1 : i32
    %31 = arith.select %30, %c1_i32_19, %c2_i32 : i32
    %32 = vector.broadcast %31 : i32 to vector<8x8xi32>
    %33 = arith.remsi %25, %32 : vector<8x8xi32>
    %c0_i32_20 = arith.constant 0 : i32
    %34 = vector.broadcast %c0_i32_20 : i32 to vector<8x8xi32>
    %35 = arith.cmpi ne, %33, %34 : vector<8x8xi32>
    %c0_i32_21 = arith.constant 0 : i32
    %36 = vector.broadcast %c0_i32_21 : i32 to vector<8x8xi32>
    %37 = arith.cmpi slt, %33, %36 : vector<8x8xi32>
    %c0_i32_22 = arith.constant 0 : i32
    %38 = arith.cmpi slt, %31, %c0_i32_22 : i32
    %39 = vector.broadcast %38 : i1 to vector<8x8xi1>
    %40 = vector.broadcast %39 : vector<8x8xi1> to vector<8x8xi1>
    %41 = arith.xori %37, %40 : vector<8x8xi1>
    %42 = arith.andi %41, %35 : vector<8x8xi1>
    %43 = vector.broadcast %31 : i32 to vector<8x8xi32>
    %44 = arith.addi %33, %43 : vector<8x8xi32>
    %45 = arith.select %42, %44, %33 : vector<8x8xi1>, vector<8x8xi32>
    %c0_i32_23 = arith.constant 0 : i32
    %46 = vector.broadcast %c0_i32_23 : i32 to vector<8x8xi32>
    %47 = arith.cmpi eq, %45, %46 : vector<8x8xi32>
    %48 = arith.andi %29, %47 : vector<8x8xi1>
    %c1_i32_24 = arith.constant 1 : i32
    %49 = vector.broadcast %c1_i32_24 : i32 to vector<8x8xi32>
    %50 = arith.subi %25, %49 : vector<8x8xi32>
    %51 = arith.cmpi eq, %26, %50 : vector<8x8xi32>
    %c2_i32_25 = arith.constant 2 : i32
    %c0_i32_26 = arith.constant 0 : i32
    %52 = arith.cmpi eq, %c2_i32_25, %c0_i32_26 : i32
    %c1_i32_27 = arith.constant 1 : i32
    %53 = arith.select %52, %c1_i32_27, %c2_i32_25 : i32
    %54 = vector.broadcast %53 : i32 to vector<8x8xi32>
    %55 = arith.remsi %25, %54 : vector<8x8xi32>
    %c0_i32_28 = arith.constant 0 : i32
    %56 = vector.broadcast %c0_i32_28 : i32 to vector<8x8xi32>
    %57 = arith.cmpi ne, %55, %56 : vector<8x8xi32>
    %c0_i32_29 = arith.constant 0 : i32
    %58 = vector.broadcast %c0_i32_29 : i32 to vector<8x8xi32>
    %59 = arith.cmpi slt, %55, %58 : vector<8x8xi32>
    %c0_i32_30 = arith.constant 0 : i32
    %60 = arith.cmpi slt, %53, %c0_i32_30 : i32
    %61 = vector.broadcast %60 : i1 to vector<8x8xi1>
    %62 = vector.broadcast %61 : vector<8x8xi1> to vector<8x8xi1>
    %63 = arith.xori %59, %62 : vector<8x8xi1>
    %64 = arith.andi %63, %57 : vector<8x8xi1>
    %65 = vector.broadcast %53 : i32 to vector<8x8xi32>
    %66 = arith.addi %55, %65 : vector<8x8xi32>
    %67 = arith.select %64, %66, %55 : vector<8x8xi1>, vector<8x8xi32>
    %c1_i32_31 = arith.constant 1 : i32
    %68 = vector.broadcast %c1_i32_31 : i32 to vector<8x8xi32>
    %69 = arith.cmpi eq, %67, %68 : vector<8x8xi32>
    %70 = arith.andi %51, %69 : vector<8x8xi1>
    %cst_32 = arith.constant -1.000000e+00 : f32
    %cst_33 = arith.constant 0.000000e+00 : f32
    %71 = vector.broadcast %cst_32 : f32 to vector<8x8xf32>
    %72 = vector.broadcast %cst_33 : f32 to vector<8x8xf32>
    %73 = arith.select %70, %71, %72 : vector<8x8xi1>, vector<8x8xf32>
    %cst_34 = arith.constant 1.000000e+00 : f32
    %74 = vector.broadcast %cst_34 : f32 to vector<8x8xf32>
    %75 = arith.select %48, %74, %73 : vector<8x8xi1>, vector<8x8xf32>
    %76 = vector.extract_strided_slice %19 {offsets = [0, 0], sizes = [8, 8], strides = [1, 1]} : vector<8x16xf32> to vector<8x8xf32>
    %77 = arith.mulf %76, %23 : vector<8x8xf32>
    %cst_35 = arith.constant dense<0.000000e+00> : vector<8x8xf32>
    %78 = tpu.matmul %76, %75, %cst_35 {dimension_numbers = #tpu.dot_dimension_numbers<[1], [0], [0], [1], [0, 0, 1, 1], [], []>} : vector<8x8xf32>, vector<8x8xf32>, vector<8x8xf32> -> vector<8x8xf32>
    %79 = arith.mulf %78, %24 : vector<8x8xf32>
    %80 = arith.addf %77, %79 : vector<8x8xf32>
    %81 = arith.truncf %80 : vector<8x8xf32> to vector<8x8xbf16>
    %82 = vector.extract_strided_slice %22 {offsets = [0, 0], sizes = [8, 8], strides = [1, 1]} : vector<8x16xf32> to vector<8x8xf32>
    %83 = arith.truncf %82 : vector<8x8xf32> to vector<8x8xbf16>
    %84 = vector.extract_strided_slice %19 {offsets = [0, 8], sizes = [8, 8], strides = [1, 1]} : vector<8x16xf32> to vector<8x8xf32>
    %85 = arith.mulf %84, %23 : vector<8x8xf32>
    %cst_36 = arith.constant dense<0.000000e+00> : vector<8x8xf32>
    %86 = tpu.matmul %84, %75, %cst_36 {dimension_numbers = #tpu.dot_dimension_numbers<[1], [0], [0], [1], [0, 0, 1, 1], [], []>} : vector<8x8xf32>, vector<8x8xf32>, vector<8x8xf32> -> vector<8x8xf32>
    %87 = arith.mulf %86, %24 : vector<8x8xf32>
    %88 = arith.addf %85, %87 : vector<8x8xf32>
    %89 = arith.truncf %88 : vector<8x8xf32> to vector<8x8xbf16>
    %90 = vector.extract_strided_slice %22 {offsets = [0, 8], sizes = [8, 8], strides = [1, 1]} : vector<8x16xf32> to vector<8x8xf32>
    %91 = arith.truncf %90 : vector<8x8xf32> to vector<8x8xbf16>
    %92 = tpu.iota {dimensions = array<i32: 1>} : vector<8x8xi32>
    %93 = tpu.iota {dimensions = array<i32: 0>} : vector<8x8xi32>
    %c0_37 = arith.constant 0 : index
    %c0_38 = arith.constant 0 : index
    %c0_39 = arith.constant 0 : index
    %94 = vector.load %arg2[%c0_37, %c0_38, %c0_39] : memref<1x8x32xf32, #tpu.memory_space<vmem>>, vector<1x8x32xf32>
    %95 = vector.shape_cast %94 : vector<1x8x32xf32> to vector<8x32xf32>
    %c0_40 = arith.constant 0 : index
    %c0_41 = arith.constant 0 : index
    %c0_42 = arith.constant 0 : index
    %96 = vector.load %arg3[%c0_40, %c0_41, %c0_42] : memref<1x1x32xf32, #tpu.memory_space<vmem>>, vector<1x1x32xf32>
    %97 = vector.shape_cast %96 : vector<1x1x32xf32> to vector<1x32xf32>
    %98 = arith.mulf %95, %95 : vector<8x32xf32>
    %cst_43 = arith.constant dense<0.000000e+00> : vector<8xf32>
    %99 = vector.multi_reduction <add>, %98, %cst_43 [1] : vector<8x32xf32> to vector<8xf32>
    %100 = vector.shape_cast %99 : vector<8xf32> to vector<8x1xf32>
    %cst_44 = arith.constant 3.200000e+01 : f32
    %101 = vector.broadcast %cst_44 : f32 to vector<8x1xf32>
    %102 = arith.divf %100, %101 : vector<8x1xf32>
    %cst_45 = arith.constant 9.99999974E-6 : f32
    %103 = vector.broadcast %cst_45 : f32 to vector<8x1xf32>
    %104 = arith.addf %102, %103 : vector<8x1xf32>
    %105 = math.rsqrt %104 : vector<8x1xf32>
    %106 = vector.broadcast %105 : vector<8x1xf32> to vector<8x32xf32>
    %107 = arith.mulf %95, %106 : vector<8x32xf32>
    %108 = vector.broadcast %97 : vector<1x32xf32> to vector<8x32xf32>
    %109 = arith.mulf %107, %108 : vector<8x32xf32>
    %110 = arith.truncf %109 : vector<8x32xf32> to vector<8x32xbf16>
    %c0_46 = arith.constant 0 : index
    %c0_47 = arith.constant 0 : index
    %c0_48 = arith.constant 0 : index
    %111 = vector.load %arg4[%c0_46, %c0_47, %c0_48] : memref<1x32x32xbf16, #tpu.memory_space<vmem>>, vector<1x32x32xbf16>
    %112 = vector.shape_cast %111 : vector<1x32x32xbf16> to vector<32x32xbf16>
    %cst_49 = arith.constant dense<0.000000e+00> : vector<8x32xf32>
    %113 = tpu.matmul %110, %112, %cst_49 {dimension_numbers = #tpu.dot_dimension_numbers<[1], [0], [0], [1], [0, 0, 1, 1], [], []>} : vector<8x32xbf16>, vector<32x32xbf16>, vector<8x32xf32> -> vector<8x32xf32>
    %c0_50 = arith.constant 0 : index
    %c0_51 = arith.constant 0 : index
    %114 = vector.load %arg12[%c0_50, %c0_51] : memref<8x8xf32, #tpu.memory_space<vmem>>, vector<8x8xf32>
    %c0_52 = arith.constant 0 : index
    %c0_53 = arith.constant 0 : index
    %115 = vector.load %arg13[%c0_52, %c0_53] : memref<8x8xf32, #tpu.memory_space<vmem>>, vector<8x8xf32>
    %116 = tpu.concatenate %114, %114 in 0 : vector<8x8xf32>, vector<8x8xf32> -> vector<16x8xf32>
    %117 = tpu.concatenate %115, %115 in 0 : vector<8x8xf32>, vector<8x8xf32> -> vector<16x8xf32>
    %c0_i32_54 = arith.constant 0 : i32
    %118 = vector.broadcast %c0_i32_54 : i32 to vector<8x8xi32>
    %119 = arith.addi %93, %118 : vector<8x8xi32>
    %120 = arith.cmpi sgt, %92, %119 : vector<8x8xi32>
    %cst_55 = arith.constant -1.000000e+30 : f32
    %cst_56 = arith.constant 0.000000e+00 : f32
    %121 = vector.broadcast %cst_55 : f32 to vector<8x8xf32>
    %122 = vector.broadcast %cst_56 : f32 to vector<8x8xf32>
    %123 = arith.select %120, %121, %122 : vector<8x8xi1>, vector<8x8xf32>
    %124 = tpu.concatenate %123, %123 in 0 : vector<8x8xf32>, vector<8x8xf32> -> vector<16x8xf32>
    %125 = vector.extract_strided_slice %113 {offsets = [0, 0], sizes = [8, 8], strides = [1, 1]} : vector<8x32xf32> to vector<8x8xf32>
    %126 = vector.extract_strided_slice %113 {offsets = [0, 8], sizes = [8, 8], strides = [1, 1]} : vector<8x32xf32> to vector<8x8xf32>
    %127 = tpu.concatenate %125, %126 in 0 : vector<8x8xf32>, vector<8x8xf32> -> vector<16x8xf32>
    %128 = arith.mulf %127, %116 : vector<16x8xf32>
    %cst_57 = arith.constant dense<0.000000e+00> : vector<16x8xf32>
    %129 = tpu.matmul %127, %75, %cst_57 {dimension_numbers = #tpu.dot_dimension_numbers<[1], [0], [0], [1], [0, 0, 1, 1], [], []>} : vector<16x8xf32>, vector<8x8xf32>, vector<16x8xf32> -> vector<16x8xf32>
    %130 = arith.mulf %129, %117 : vector<16x8xf32>
    %131 = arith.addf %128, %130 : vector<16x8xf32>
    %132 = arith.truncf %131 : vector<16x8xf32> to vector<16x8xbf16>
    %cst_58 = arith.constant dense<0.000000e+00> : vector<16x8xf32>
    %133 = tpu.matmul %132, %81, %cst_58 {dimension_numbers = #tpu.dot_dimension_numbers<[1], [1], [0], [0], [0, 0, 1, 0], [], []>} : vector<16x8xbf16>, vector<8x8xbf16>, vector<16x8xf32> -> vector<16x8xf32>
    %cst_59 = arith.constant 0.353553385 : f32
    %134 = vector.broadcast %cst_59 : f32 to vector<16x8xf32>
    %135 = arith.mulf %133, %134 : vector<16x8xf32>
    %136 = arith.addf %135, %124 : vector<16x8xf32>
    %cst_60 = arith.constant dense<0xFF800000> : vector<16xf32>
    %137 = vector.multi_reduction <maximumf>, %136, %cst_60 [1] : vector<16x8xf32> to vector<16xf32>
    %138 = vector.shape_cast %137 : vector<16xf32> to vector<16x1xf32>
    %139 = vector.broadcast %138 : vector<16x1xf32> to vector<16x8xf32>
    %140 = arith.subf %136, %139 : vector<16x8xf32>
    %141 = math.exp %140 : vector<16x8xf32>
    %cst_61 = arith.constant dense<0.000000e+00> : vector<16xf32>
    %142 = vector.multi_reduction <add>, %141, %cst_61 [1] : vector<16x8xf32> to vector<16xf32>
    %143 = vector.shape_cast %142 : vector<16xf32> to vector<16x1xf32>
    %144 = tpu.reciprocal %143 {approx = true} : vector<16x1xf32> -> vector<16x1xf32>
    %145 = vector.broadcast %144 : vector<16x1xf32> to vector<16x8xf32>
    %146 = arith.mulf %141, %145 : vector<16x8xf32>
    %147 = arith.truncf %146 : vector<16x8xf32> to vector<16x8xbf16>
    %cst_62 = arith.constant dense<0.000000e+00> : vector<16x8xf32>
    %148 = tpu.matmul %147, %83, %cst_62 {dimension_numbers = #tpu.dot_dimension_numbers<[1], [0], [0], [1], [0, 0, 1, 1], [], []>} : vector<16x8xbf16>, vector<8x8xbf16>, vector<16x8xf32> -> vector<16x8xf32>
    %149 = vector.extract_strided_slice %148 {offsets = [0, 0], sizes = [8, 8], strides = [1, 1]} : vector<16x8xf32> to vector<8x8xf32>
    %150 = vector.extract_strided_slice %148 {offsets = [8, 0], sizes = [8, 8], strides = [1, 1]} : vector<16x8xf32> to vector<8x8xf32>
    %151 = vector.extract_strided_slice %113 {offsets = [0, 16], sizes = [8, 8], strides = [1, 1]} : vector<8x32xf32> to vector<8x8xf32>
    %152 = vector.extract_strided_slice %113 {offsets = [0, 24], sizes = [8, 8], strides = [1, 1]} : vector<8x32xf32> to vector<8x8xf32>
    %153 = tpu.concatenate %151, %152 in 0 : vector<8x8xf32>, vector<8x8xf32> -> vector<16x8xf32>
    %154 = arith.mulf %153, %116 : vector<16x8xf32>
    %cst_63 = arith.constant dense<0.000000e+00> : vector<16x8xf32>
    %155 = tpu.matmul %153, %75, %cst_63 {dimension_numbers = #tpu.dot_dimension_numbers<[1], [0], [0], [1], [0, 0, 1, 1], [], []>} : vector<16x8xf32>, vector<8x8xf32>, vector<16x8xf32> -> vector<16x8xf32>
    %156 = arith.mulf %155, %117 : vector<16x8xf32>
    %157 = arith.addf %154, %156 : vector<16x8xf32>
    %158 = arith.truncf %157 : vector<16x8xf32> to vector<16x8xbf16>
    %cst_64 = arith.constant dense<0.000000e+00> : vector<16x8xf32>
    %159 = tpu.matmul %158, %89, %cst_64 {dimension_numbers = #tpu.dot_dimension_numbers<[1], [1], [0], [0], [0, 0, 1, 0], [], []>} : vector<16x8xbf16>, vector<8x8xbf16>, vector<16x8xf32> -> vector<16x8xf32>
    %cst_65 = arith.constant 0.353553385 : f32
    %160 = vector.broadcast %cst_65 : f32 to vector<16x8xf32>
    %161 = arith.mulf %159, %160 : vector<16x8xf32>
    %162 = arith.addf %161, %124 : vector<16x8xf32>
    %cst_66 = arith.constant dense<0xFF800000> : vector<16xf32>
    %163 = vector.multi_reduction <maximumf>, %162, %cst_66 [1] : vector<16x8xf32> to vector<16xf32>
    %164 = vector.shape_cast %163 : vector<16xf32> to vector<16x1xf32>
    %165 = vector.broadcast %164 : vector<16x1xf32> to vector<16x8xf32>
    %166 = arith.subf %162, %165 : vector<16x8xf32>
    %167 = math.exp %166 : vector<16x8xf32>
    %cst_67 = arith.constant dense<0.000000e+00> : vector<16xf32>
    %168 = vector.multi_reduction <add>, %167, %cst_67 [1] : vector<16x8xf32> to vector<16xf32>
    %169 = vector.shape_cast %168 : vector<16xf32> to vector<16x1xf32>
    %170 = tpu.reciprocal %169 {approx = true} : vector<16x1xf32> -> vector<16x1xf32>
    %171 = vector.broadcast %170 : vector<16x1xf32> to vector<16x8xf32>
    %172 = arith.mulf %167, %171 : vector<16x8xf32>
    %173 = arith.truncf %172 : vector<16x8xf32> to vector<16x8xbf16>
    %cst_68 = arith.constant dense<0.000000e+00> : vector<16x8xf32>
    %174 = tpu.matmul %173, %91, %cst_68 {dimension_numbers = #tpu.dot_dimension_numbers<[1], [0], [0], [1], [0, 0, 1, 1], [], []>} : vector<16x8xbf16>, vector<8x8xbf16>, vector<16x8xf32> -> vector<16x8xf32>
    %175 = vector.extract_strided_slice %174 {offsets = [0, 0], sizes = [8, 8], strides = [1, 1]} : vector<16x8xf32> to vector<8x8xf32>
    %176 = vector.extract_strided_slice %174 {offsets = [8, 0], sizes = [8, 8], strides = [1, 1]} : vector<16x8xf32> to vector<8x8xf32>
    %177 = tpu.concatenate %149, %150, %175, %176 in 1 : vector<8x8xf32>, vector<8x8xf32>, vector<8x8xf32>, vector<8x8xf32> -> vector<8x32xf32>
    %178 = arith.truncf %177 : vector<8x32xf32> to vector<8x32xbf16>
    %c0_69 = arith.constant 0 : index
    %c0_70 = arith.constant 0 : index
    %c0_71 = arith.constant 0 : index
    %179 = vector.load %arg7[%c0_69, %c0_70, %c0_71] : memref<1x32x32xbf16, #tpu.memory_space<vmem>>, vector<1x32x32xbf16>
    %180 = vector.shape_cast %179 : vector<1x32x32xbf16> to vector<32x32xbf16>
    %cst_72 = arith.constant dense<0.000000e+00> : vector<8x32xf32>
    %181 = tpu.matmul %178, %180, %cst_72 {dimension_numbers = #tpu.dot_dimension_numbers<[1], [0], [0], [1], [0, 0, 1, 1], [], []>} : vector<8x32xbf16>, vector<32x32xbf16>, vector<8x32xf32> -> vector<8x32xf32>
    %182 = arith.addf %95, %181 : vector<8x32xf32>
    %c0_73 = arith.constant 0 : index
    %c0_74 = arith.constant 0 : index
    %c0_75 = arith.constant 0 : index
    %183 = vector.load %arg8[%c0_73, %c0_74, %c0_75] : memref<1x1x32xf32, #tpu.memory_space<vmem>>, vector<1x1x32xf32>
    %184 = vector.shape_cast %183 : vector<1x1x32xf32> to vector<1x32xf32>
    %185 = arith.mulf %182, %182 : vector<8x32xf32>
    %cst_76 = arith.constant dense<0.000000e+00> : vector<8xf32>
    %186 = vector.multi_reduction <add>, %185, %cst_76 [1] : vector<8x32xf32> to vector<8xf32>
    %187 = vector.shape_cast %186 : vector<8xf32> to vector<8x1xf32>
    %cst_77 = arith.constant 3.200000e+01 : f32
    %188 = vector.broadcast %cst_77 : f32 to vector<8x1xf32>
    %189 = arith.divf %187, %188 : vector<8x1xf32>
    %cst_78 = arith.constant 9.99999974E-6 : f32
    %190 = vector.broadcast %cst_78 : f32 to vector<8x1xf32>
    %191 = arith.addf %189, %190 : vector<8x1xf32>
    %192 = math.rsqrt %191 : vector<8x1xf32>
    %193 = vector.broadcast %192 : vector<8x1xf32> to vector<8x32xf32>
    %194 = arith.mulf %182, %193 : vector<8x32xf32>
    %195 = vector.broadcast %184 : vector<1x32xf32> to vector<8x32xf32>
    %196 = arith.mulf %194, %195 : vector<8x32xf32>
    %197 = arith.truncf %196 : vector<8x32xf32> to vector<8x32xbf16>
    %c0_79 = arith.constant 0 : index
    %c0_80 = arith.constant 0 : index
    %c0_81 = arith.constant 0 : index
    %198 = vector.load %arg9[%c0_79, %c0_80, %c0_81] : memref<1x32x128xbf16, #tpu.memory_space<vmem>>, vector<1x32x128xbf16>
    %199 = vector.shape_cast %198 : vector<1x32x128xbf16> to vector<32x128xbf16>
    %cst_82 = arith.constant dense<0.000000e+00> : vector<8x128xf32>
    %200 = tpu.matmul %197, %199, %cst_82 {dimension_numbers = #tpu.dot_dimension_numbers<[1], [0], [0], [1], [0, 0, 1, 1], [], []>} : vector<8x32xbf16>, vector<32x128xbf16>, vector<8x128xf32> -> vector<8x128xf32>
    %c0_83 = arith.constant 0 : index
    %c0_84 = arith.constant 0 : index
    %c0_85 = arith.constant 0 : index
    %201 = vector.load %arg10[%c0_83, %c0_84, %c0_85] : memref<1x32x128xbf16, #tpu.memory_space<vmem>>, vector<1x32x128xbf16>
    %202 = vector.shape_cast %201 : vector<1x32x128xbf16> to vector<32x128xbf16>
    %cst_86 = arith.constant dense<0.000000e+00> : vector<8x128xf32>
    %203 = tpu.matmul %197, %202, %cst_86 {dimension_numbers = #tpu.dot_dimension_numbers<[1], [0], [0], [1], [0, 0, 1, 1], [], []>} : vector<8x32xbf16>, vector<32x128xbf16>, vector<8x128xf32> -> vector<8x128xf32>
    %204 = arith.negf %200 : vector<8x128xf32>
    %205 = math.exp %204 : vector<8x128xf32>
    %cst_87 = arith.constant 1.000000e+00 : f32
    %206 = vector.broadcast %cst_87 : f32 to vector<8x128xf32>
    %207 = arith.addf %206, %205 : vector<8x128xf32>
    %208 = arith.divf %206, %207 : vector<8x128xf32>
    %209 = arith.mulf %200, %208 : vector<8x128xf32>
    %210 = arith.mulf %209, %203 : vector<8x128xf32>
    %211 = arith.truncf %210 : vector<8x128xf32> to vector<8x128xbf16>
    %c0_88 = arith.constant 0 : index
    %c0_89 = arith.constant 0 : index
    %c0_90 = arith.constant 0 : index
    %212 = vector.load %arg11[%c0_88, %c0_89, %c0_90] : memref<1x128x32xbf16, #tpu.memory_space<vmem>>, vector<1x128x32xbf16>
    %213 = vector.shape_cast %212 : vector<1x128x32xbf16> to vector<128x32xbf16>
    %cst_91 = arith.constant dense<0.000000e+00> : vector<8x32xf32>
    %214 = tpu.matmul %211, %213, %cst_91 {dimension_numbers = #tpu.dot_dimension_numbers<[1], [0], [0], [1], [0, 0, 1, 1], [], []>} : vector<8x128xbf16>, vector<128x32xbf16>, vector<8x32xf32> -> vector<8x32xf32>
    %215 = arith.addf %182, %214 : vector<8x32xf32>
    %c0_92 = arith.constant 0 : index
    %c0_93 = arith.constant 0 : index
    %c0_94 = arith.constant 0 : index
    %216 = vector.load %arg14[%c0_92, %c0_93, %c0_94] : memref<1x8x32xf32, #tpu.memory_space<vmem>>, vector<1x8x32xf32>
    %217 = vector.shape_cast %216 : vector<1x8x32xf32> to vector<8x32xf32>
    %218 = vector.shape_cast %215 : vector<8x32xf32> to vector<1x8x32xf32>
    tpu.vector_store %arg14[%c0_92, %c0_93, %c0_94], %218 {strides = array<i32>} : memref<1x8x32xf32, #tpu.memory_space<vmem>>, vector<1x8x32xf32>,
    return
  }
  func.func @transform_0(%arg0: i32, %arg1: i32) -> (i32, i32, i32) {
    %c0_i32 = arith.constant 0 : i32
    %c0_i32_0 = arith.constant 0 : i32
    %c0_i32_1 = arith.constant 0 : i32
    return %arg0, %c0_i32, %c0_i32_0 : i32, i32, i32
  }
  func.func @transform_1(%arg0: i32, %arg1: i32) -> (i32, i32, i32) {
    %c0_i32 = arith.constant 0 : i32
    %c0_i32_0 = arith.constant 0 : i32
    %c0_i32_1 = arith.constant 0 : i32
    return %arg1, %c0_i32, %c0_i32_0 : i32, i32, i32
  }
  func.func @transform_2(%arg0: i32, %arg1: i32) -> (i32, i32, i32) {
    %c0_i32 = arith.constant 0 : i32
    %c0_i32_0 = arith.constant 0 : i32
    %c0_i32_1 = arith.constant 0 : i32
    return %arg1, %c0_i32, %c0_i32_0 : i32, i32, i32
  }
  func.func @transform_3(%arg0: i32, %arg1: i32) -> (i32, i32, i32) {
    %c0_i32 = arith.constant 0 : i32
    %c0_i32_0 = arith.constant 0 : i32
    %c0_i32_1 = arith.constant 0 : i32
    return %arg1, %c0_i32, %c0_i32_0 : i32, i32, i32
  }
  func.func @transform_4(%arg0: i32, %arg1: i32) -> (i32, i32, i32) {
    %c0_i32 = arith.constant 0 : i32
    %c0_i32_0 = arith.constant 0 : i32
    %c0_i32_1 = arith.constant 0 : i32
    return %arg1, %c0_i32, %c0_i32_0 : i32, i32, i32
  }
  func.func @transform_5(%arg0: i32, %arg1: i32) -> (i32, i32, i32) {
    %c0_i32 = arith.constant 0 : i32
    %c0_i32_0 = arith.constant 0 : i32
    %c0_i32_1 = arith.constant 0 : i32
    return %arg1, %c0_i32, %c0_i32_0 : i32, i32, i32
  }
  func.func @transform_6(%arg0: i32, %arg1: i32) -> (i32, i32, i32) {
    %c0_i32 = arith.constant 0 : i32
    %c0_i32_0 = arith.constant 0 : i32
    %c0_i32_1 = arith.constant 0 : i32
    return %arg1, %c0_i32, %c0_i32_0 : i32, i32, i32
  }
  func.func @transform_7(%arg0: i32, %arg1: i32) -> (i32, i32, i32) {
    %c0_i32 = arith.constant 0 : i32
    %c0_i32_0 = arith.constant 0 : i32
    %c0_i32_1 = arith.constant 0 : i32
    return %arg1, %c0_i32, %c0_i32_0 : i32, i32, i32
  }
  func.func @transform_8(%arg0: i32, %arg1: i32) -> (i32, i32, i32) {
    %c0_i32 = arith.constant 0 : i32
    %c0_i32_0 = arith.constant 0 : i32
    %c0_i32_1 = arith.constant 0 : i32
    return %arg1, %c0_i32, %c0_i32_0 : i32, i32, i32
  }
  func.func @transform_9(%arg0: i32, %arg1: i32) -> (i32, i32, i32) {
    %c0_i32 = arith.constant 0 : i32
    %c0_i32_0 = arith.constant 0 : i32
    %c0_i32_1 = arith.constant 0 : i32
    return %arg1, %c0_i32, %c0_i32_0 : i32, i32, i32
  }
  func.func @transform_10(%arg0: i32, %arg1: i32) -> (i32, i32) {
    %c0_i32 = arith.constant 0 : i32
    %c0_i32_0 = arith.constant 0 : i32
    %c0_i32_1 = arith.constant 0 : i32
    return %c0_i32, %c0_i32_0 : i32, i32
  }
  func.func @transform_11(%arg0: i32, %arg1: i32) -> (i32, i32) {
    %c0_i32 = arith.constant 0 : i32
    %c0_i32_0 = arith.constant 0 : i32
    %c0_i32_1 = arith.constant 0 : i32
    return %c0_i32, %c0_i32_0 : i32, i32
  }
  func.func @transform_12(%arg0: i32, %arg1: i32) -> (i32, i32, i32) {
    %c0_i32 = arith.constant 0 : i32
    %c0_i32_0 = arith.constant 0 : i32
    %c0_i32_1 = arith.constant 0 : i32
    return %arg0, %c0_i32, %c0_i32_0 : i32, i32, i32
  }
}

</mosaic_0001>

<bundles_post_ra>
// kernel: tpu_custom_call.1
= control target key start
LH: loop header
LB: loop body
LE: loop exit
PB: predicated region body
PF: predicated region fallthrough
CT: control target
= control target key end

     0   :  { %6 = vsyncpa [#allocation3], 0  ;;  %s140_s0 = inlined_call_operand.hbm [shape: f32[8,8], index: 0, kind: input, shape index: {}]   ;;  %s141_s1 = inlined_call_operand.hbm [shape: f32[8,8], index: 1, kind: output, shape index: {}]  }
   0x1   :  { %7 = vsyncpa [#allocation4], 0  ;;  %s102_s6 = smov [#allocation2]   ;;  %s54_s10 = scalar_lea.hbm %s140_s0, 128 }
   0x2   :  { %s14_s7 = sshll.u32 %s102_s6, 4  ;;  %p55_p0 = scmp.ne.s32.totalorder %s140_s0, %s54_s10  ;;  %s15_s7 = int_to_ptr.vmem [resolvable:$true] %s14_s7 }
   0x3   :  { %p58_p1 = scmp.lt.u32.totalorder %s54_s10, %s140_s0 }
   0x5   :  { %p60_p2 = pnand %p58_p1, %p55_p0 }
   0x7   :  { %63 = shalt.err (!%p60_p2)
}
   0x8   :  { %s64_s15 = scalar_lea.vmem %s15_s7, 128  ;;  %p69_p4 = scmp.lt.s32.totalorder %s15_s7, %s15_s7 }
   0x9   :  { %p65_p3 = scmp.ne.s32.totalorder %s15_s7, %s64_s15  ;;  %p70_p5 = scmp.lt.s32.totalorder %s64_s15, %s64_s15 }
   0xb   :  { %p71_p6 = por %p70_p5, %p69_p4 }
   0xd   :  { %p72_p7 = pnand %p71_p6, %p65_p3 }
   0xf   :  { %75 = shalt.err (!%p72_p7)
}
  0x10   :  { %17 = dma.hbm_to_vmem [thread:$0]  %s140_s0, 128, %s15_s7, [#allocation3]  }
  0x11   :  { %98 = dma.done.wait [#allocation3], 128  }
  0x12   :  { %99 = vsyncadd [#allocation3], 4294967168  ;;  %v21_v0 = vld [vmem:[#allocation2] sm:$0xff]  ;;  %s103_s18 = smov 8   ;;  %vm22_vm0 = vcmask 1047616   ;;  %s104_s19 = smov 121  }
  0x13   :  { %23 = vrot.lane.b32.xlu0 %v21_v0, %s103_s18  ;;  %s105_s20 = smov [#allocation5]   ;;  %vm33_vm1 = vcmask 64512  }
  0x14   :  { %s41_s21 = sshll.u32 %s105_s20, 4  ;;  %s42_s21 = int_to_ptr.vmem [resolvable:$true] %s41_s21 }
  0x15   :  { %s76_s0 = scalar_lea.vmem %s42_s21, 128  ;;  %p81_p9 = scmp.lt.s32.totalorder %s42_s21, %s42_s21 }
  0x16   :  { %p77_p8 = scmp.ne.s32.totalorder %s42_s21, %s76_s0  ;;  %p82_p10 = scmp.lt.s32.totalorder %s76_s0, %s76_s0 }
  0x18   :  { %p83_p11 = por %p82_p10, %p81_p9 }
  0x1a   :  { %p84_p12 = pnand %p83_p11, %p77_p8 }
  0x85   :  { %v24_v1 = vpop.permute.xlu0 %23 }
  0x86   :  { %v25_v2 = vsel %vm22_vm0, %v24_v1, %v21_v0 }
  0x87   :  { %26 = vrot.lane.b32.xlu0 %v25_v2, %s103_s18 }
  0xf9   :  { %v27_v3 = vpop.permute.xlu0 %26 }
  0xfa   :  { %v28_v4 = vsel %vm22_vm0, %v27_v3, %v21_v0 }
  0xfb   :  { %30 = vrot.lane.b32.xlu1 %v28_v4, %s104_s19 }
 0x16d   :  { %v31_v5 = vpop.permute.xlu1 %30 }
 0x16e   :  { %34 = vst.msk [vmem:[#allocation5] sm:$0xff] %vm33_vm1, %v31_v5 }
 0x16f   :  { %87 = shalt.err (!%p84_p12)
}
 0x170   :  { %s88_s24 = scalar_lea.hbm %s141_s1, 128 }
 0x171   :  { %p89_p13 = scmp.ne.s32.totalorder %s141_s1, %s88_s24  ;;  %p92_p0 = scmp.lt.u32.totalorder %s88_s24, %s141_s1 }
 0x173   :  { %p94_p1 = pnand %p92_p0, %p89_p13 }
 0x175   :  { %97 = shalt.err (!%p94_p1)
}
 0x176   :  { %44 = dma.vmem_to_hbm [thread:$0]  %s42_s21, 128, %s141_s1, [#allocation4]  }
 0x177   :  { %100 = dma.done.wait [#allocation4], 128  }
 0x178   :  { %101 = vsyncadd [#allocation4], 4294967168 }
 0x179   :  { %48 = vsyncpa [#allocation3], 1 }
 0x17a   :  { %49 = vsyncpa [#allocation4], 1 }

// kernel: tpu_custom_call.1
= control target key start
LH: loop header
LB: loop body
LE: loop exit
PB: predicated region body
PF: predicated region fallthrough
CT: control target
= control target key end

     0   :  { %6 = vsyncpa [#allocation3], 0  ;;  %s341_s0 = inlined_call_operand.hbm [shape: f32[8,128], index: 0, kind: input, shape index: {}]   ;;  %s342_s1 = inlined_call_operand.hbm [shape: f32[8,128], index: 1, kind: output, shape index: {}]  }
   0x1   :  { %7 = vsyncpa [#allocation4], 0  ;;  %s262_s6 = smov 0  }
   0x2 LB: > { %s145_s7 = sadd.s32 4294967295, %s248_s6   ;;  %p146_p0 = scmp.ge.s32.totalorder %s248_s6, 1  ;;  %s248_s6 = sphi %s262_s6, %s13_s6  }
   0x3   : > { %p60_p1 = scmp.lt.s32.totalorder %s248_s6, 3  ;;  %p276_p3 = scmp.eq.s32.totalorder %s145_s7, 0 }
   0x4   : > { %s250_s10 = smov [#allocation2]   ;;  %s180_s15 = scalar_lea.hbm %s341_s0, 128 }
   0x5   : > { %p270_p2 = pnand %p146_p0, %p60_p1  ;;  %s73_s11 = sshll.u32 %s250_s10, 4  ;;  %s74_s11 = int_to_ptr.vmem [resolvable:$true] %s73_s11 }
   0x6   : > { %s347_s9 = scalar_select %p276_p3, 1, 0 }
   0x7   : > { %s346_s8 = scalar_select %p270_p2, 1, 0 }
   0x8   : > { %p162_p4 = pneg %p270_p2  ;;  %p181_p6 = scmp.ne.s32.totalorder %s341_s0, %s180_s15 }
   0x9   : > { %p187_p10 = scmp.lt.u32.totalorder %s180_s15, %s341_s0 }
   0xa   : > { %p284_p5 = pnand %p276_p3, %p162_p4 }
   0xc   : > { %p182_p7 = pneg %p284_p5 }
   0xe   : > { %p183_p8 = pnand %p182_p7, %p181_p6 }
  0x10   : > { %p184_p9 = pneg %p183_p8 }
  0x12   : > { %p189_p11 = pnand %p187_p10, %p184_p9 }
  0x14   : > { %192 = shalt.err (!%p189_p11)
}
  0x15   : > { %s193_s20 = scalar_lea.vmem %s74_s11, 128  ;;  %p201_p1 = scmp.lt.s32.totalorder %s74_s11, %s74_s11 }
  0x16   : > { %p194_p12 = scmp.ne.s32.totalorder %s74_s11, %s193_s20  ;;  %p202_p4 = scmp.lt.s32.totalorder %s193_s20, %s193_s20 }
  0x18   : > { %p196_p13 = pnand %p194_p12, %p182_p7  ;;  %p203_p3 = por %p202_p4, %p201_p1 }
  0x1a   : > { %p197_p0 = pneg %p196_p13 }
  0x1c   : > { %p204_p2 = pnand %p203_p3, %p197_p0 }
  0x1e   : > { %207 = shalt.err (!%p204_p2)
}
  0x1f   : > { %165 = dma.hbm_to_vmem [thread:$0]  (!%p284_p5), %s341_s0, 128, %s74_s11, [#allocation3]  }
  0x20   : > { %p349_p6 = scmp.ne.s32.totalorder %s346_s8, 0 }
  0x21   : > { %p350_p8 = scmp.ne.s32.totalorder (!%p349_p6), %s347_s9, 0 }
  0x22   : > { %86 = sbr.rel (%p349_p6) target bundleno = 67 (0x43), region = 24 }
  0x29   : > { %239 = dma.done.wait (%p350_p8), [#allocation3], 128  }
  0x2a   : > { %241 = vsyncadd (%p350_p8), [#allocation3], 4294967168  ;;  %s251_s23 = smov [#allocation5]   ;;  %v96_v0 = vld [vmem:[#allocation2] sm:$0xff]  ;;  %p312_p2 = scmp.eq.s32.totalorder %s145_s7, 1 }
  0x2b   : > { %s106_s24 = sshll.u32 %s251_s23, 4  ;;  %v97_v1 = vadd.f32 1.0, %v96_v0  ;;  %s107_s24 = int_to_ptr.vmem [resolvable:$true] %s106_s24 }
  0x2c   : > { %s208_s26 = scalar_lea.vmem %s107_s24, 128  ;;  %p215_p9 = scmp.lt.s32.totalorder %s107_s24, %s107_s24 }
  0x2d   : > { %98 = vst [vmem:[#allocation5] sm:$0xff] %v97_v1  ;;  %p209_p3 = scmp.ne.s32.totalorder %s107_s24, %s208_s26  ;;  %p216_p10 = scmp.lt.s32.totalorder %s208_s26, %s208_s26 }
  0x2f   : > { %p210_p5 = pnand %p209_p3, %p312_p2  ;;  %p217_p11 = por %p216_p10, %p215_p9 }
  0x31   : > { %p211_p7 = pneg %p210_p5 }
  0x33   : > { %p218_p12 = pnand %p217_p11, %p211_p7 }
  0x35   : > { %221 = shalt.err (!%p218_p12)
}
  0x36   : > { %s222_s29 = scalar_lea.hbm %s342_s1, 128 }
  0x37   : > { %p223_p13 = scmp.ne.s32.totalorder %s342_s1, %s222_s29  ;;  %p228_p4 = scmp.lt.u32.totalorder %s222_s29, %s342_s1 }
  0x39   : > { %p224_p0 = pnand %p223_p13, %p312_p2 }
  0x3b   : > { %p225_p1 = pneg %p224_p0 }
  0x3d   : > { %p230_p6 = pnand %p228_p4, %p225_p1 }
  0x3f   : > { %233 = shalt.err (!%p230_p6)
}
  0x40   : > { %159 = dma.vmem_to_hbm [thread:$0]  (%p312_p2), %s107_s24, 128, %s342_s1, [#allocation4]  }
  0x41   : > { %243 = dma.done.wait (%p312_p2), [#allocation4], 128  }
  0x42   : > { %245 = vsyncadd (%p312_p2), [#allocation4], 4294967168 }
  0x43 PF: > { %s13_s6 = sadd.s32 1, %s248_s6  }
  0x44   : > { %p10_p8 = scmp.ge.s32.totalorder %s13_s6, 4  }
  0x46   :  { %12 = sbr.rel (!%p10_p8) target bundleno = 2 (0x2), region = 53 }
  0x4d   :  { %119 = vsyncpa [#allocation3], 1 }
  0x4e   :  { %121 = vsyncpa [#allocation3 + $0x1], 1 }
  0x4f   :  { %122 = vsyncpa [#allocation4], 1 }
  0x50   :  { %124 = vsyncpa [#allocation4 + $0x1], 1 }

// kernel: transformer_forward.3
= control target key start
LH: loop header
LB: loop body
LE: loop exit
PB: predicated region body
PF: predicated region fallthrough
CT: control target
= control target key end

     0   :  { %8 = vsyncpa [#allocation4], 0  ;;  %s699_s0 = inlined_call_operand.vmem [shape: f32[2,8,32], index: 0, kind: input, shape index: {}]   ;;  %s700_s1 = inlined_call_operand.vmem [shape: f32[1,32], index: 1, kind: input, shape index: {}]   ;;  %s701_s2 = inlined_call_operand.vmem [shape: bf16[32,32], index: 2, kind: input, shape index: {}]   ;;  %s702_s3 = inlined_call_operand.hbm [shape: f32[2,8,32], index: 3, kind: output, shape index: {}]  }
   0x1   :  { %10 = vsyncpa [#allocation4 + $0x1], 0  ;;  %s575_s12 = smov 0   ;;  %s577_s13 = smov 0  }
   0x2   :  { %s579_s14 = smov 0   ;;  %s581_s15 = smov 0  }
   0x3   :  { %s583_s16 = smov 0   ;;  %s585_s17 = smov 0  }
   0x4 LB: > { %s384_s18 = sadd.s32 4294967295, %s550_s17   ;;  %s385_s19 = sadd.s32 4294967294, %s550_s17   ;;  %s550_s17 = sphi %s585_s17, %s16_s17   ;;  %s546_s16 = sphi %s583_s16, %s709_s16   ;;  %s542_s15 = sphi %s581_s15, %s708_s15   ;;  %s538_s14 = sphi %s579_s14, %s707_s14   ;;  %s534_s13 = sphi %s577_s13, %s706_s13   ;;  %s530_s12 = sphi %s575_s12, %s705_s12  }
   0x5   : > { %s28_s20 = sadd.s32 1, %s546_s16  ;;  %s110_s21 = sadd.s32 1, %s538_s14 }
   0x6   : > { %p30_p0 = scmp.ge.s32.totalorder %s28_s20, 2  ;;  %p120_p1 = scmp.ne.s32.totalorder %s538_s14, %s534_s13 }
   0x7   : > { %p121_p2 = scmp.eq.s32.totalorder %s384_s18, 1  ;;  %p126_p3 = scmp.ne.s32.totalorder %s534_s13, %s530_s12 }
   0x8   : > { %s711_s20 = smov (%p30_p0, %s28_s20), 0  ;;  %p127_p5 = scmp.eq.s32.totalorder %s385_s19, 1 }
   0x9   : > { %p615_p4 = por %p121_p2, %p120_p1  ;;  %s105_s23 = ssub.s32 %s546_s16, %s711_s20 }
   0xa   : > { %p389_p6 = scmp.ge.s32.totalorder %s550_s17, 1  ;;  %p108_p7 = scmp.eq.s32.totalorder %s105_s23, 0 }
   0xb   : > { %p622_p8 = por %p127_p5, %p126_p3  ;;  %p162_p9 = scmp.lt.s32.totalorder %s550_s17, 3 }
   0xc   : > { %s628_s25 = scalar_select %p108_p7, %s538_s14, %s110_s21  }
   0xd   : > { %p163_p10 = pnand %p389_p6, %p162_p9 }
   0xe   : > { %p189_p11 = scmp.lt.s32.totalorder (!%p163_p10), %s542_s15, 1  ;;  %vm205_vm0 = vcmask (!%p163_p10), 261120   ;;  %v468_v3 = vld [vmem:[%s701_s2] sm:$0xff] (!%p163_p10)   ;;  %v552_v4 = vmov (!%p163_p10), 0.0   ;;  %v469_v5 = vld [vmem:[%s701_s2 + $0x8] sm:$0xff] (!%p163_p10)   ;;  %vm553_vm1 = vmmov (!%p163_p10), 0  }
   0xf   : > { %166 = sbr.rel (%p163_p10) target bundleno = 428 (0x1ac), region = 32  ;;  %403 = vmatprep.subr.bf16.mxu0 (!%p163_p10), %v552_v4  ;;  %407 = vmatprep.mubr.msk.bf16.mxu0 (!%p163_p10), %vm553_vm1, %v552_v4  ;;  %v392_v10 = vld [vmem:[%s700_s1] ss:$0 sm:$0xff] (!%p163_p10)  ;;  %vm222_vm2 = vcmask (!%p163_p10), 257024   ;;  %s186_s10 = sand.u32 (!%p163_p10), 1, %s534_s13  }
  0x10   : > { %404 = vmatpush3.bf16.msra.mxu0 (!%p163_p10), %v468_v3  ;;  %s390_s11 = sshll.u32 (!%p163_p10), %s186_s10, 3  ;;  %s397_s18 = sshll.u32 (!%p163_p10), %s542_s15, 7 }
  0x11   : > { %405 = vmatprep.subr.bf16.mxu0 (!%p163_p10), %v552_v4  ;;  %s188_s19 = scalar_lea.vmem (!%p163_p10), [#allocation3], %s390_s11  ;;  %s287_s28 = scalar_lea.sflag (!%p163_p10), [#allocation4], %s186_s10 }
  0x12   : > { %s301_s21 = sshll.u32 (!%p163_p10), %s188_s19, 4  ;;  %s653_s21 = int_to_ptr.vmem [resolvable:$true] %s301_s21 }
  0x13   : > { %s472_s29 = scalar_lea.vmem (!%p163_p10), %s653_s21, 128 }
  0x14   : > { %406 = vmatpush3.bf16.msra.mxu0 (!%p163_p10), %v469_v5  ;;  %p473_p12 = scmp.ne.s32.totalorder (!%p163_p10), %s653_s21, %s472_s29 }
  0x16   : > { %s190_s26 = scalar_select %p189_p11, %s542_s15, 1 }
  0x17   : > { %p474_p13 = pnand %p473_p12, %p615_p4  ;;  %s554_s15 = smov [#allocation3]  }
  0x18   : > { %s391_s27 = sshll.u32 %s190_s26, 3 }
  0x19   : > { %s192_s30 = scalar_lea.vmem %s699_s0, %s391_s27  ;;  %s651_s27 = scalar_lea.hbm %s702_s3, %s397_s18 }
  0x1a   : > { %v202_v0 = vld [vmem:[%s192_s30] sm:$0xff]  ;;  %p475_p0 = pneg %p474_p13  ;;  %s476_s30 = sshll.u32 %s554_s15, 4  ;;  %s477_s30 = int_to_ptr.vmem [resolvable:$false] %s476_s30 }
  0x1b   : > { %v204_v1 = vmul.f32 %v202_v0, %v202_v0  ;;  %s478_s4 = scalar_lea.vmem %s477_s30, 256  ;;  %p479_p1 = scmp.lt.s32.totalorder %s653_s21, %s477_s30 }
  0x1c   : > { %p480_p2 = scmp.lt.s32.totalorder %s478_s4, %s472_s29 }
  0x1d   : > { %v206_v2 = vsel %vm205_vm0, %v204_v1, 0.0 }
  0x1e   : > { %207 = vadd.xlane.f32.xlu0 %v206_v2  ;;  %p481_p3 = por %p480_p2, %p479_p1 }
  0x20   : > { %p482_p5 = pnand %p481_p3, %p475_p0 }
  0xab   : > { %v208_v6 = vpop.xlane.xlu0 %207 }
  0xac   : > { %v210_v7 = vmul.f32 0.03125, %v208_v6 }
  0xae   : > { %v211_v8 = vadd.f32 1e-06, %v210_v7 }
  0xb0   : > { %470 = vrsqrt.f32 %v211_v8 }
  0xba   : > { %v471_v9 = vpop.eup %470 }
  0xbb   : > { %v213_v11 = vmul.f32 %v471_v9, %v202_v0 }
  0xbd   : > { %v220_v12 = vmul.f32 %v392_v10, %v213_v11 }
  0xbf   : > { %v221_v13 = vpack.c.bf16 %v220_v12, %v220_v12 }
  0xc1   : > { %223 = vst.msk [vmem:[#allocation2] sm:$0xf] %vm222_vm2, %v221_v13 }
  0xc8   : > { %v224_v14 = vld [vmem:[#allocation2] sm:$0xf] }
  0xc9   : > { %408 = vmatmul.mubr.msk.bf16.vlgmr.msra.gmra.mrb[0].mxu0 %vm205_vm0, %v224_v14 }
 0x19c   : > { %v279_v15 = vpop.f32.mrb[0].mxu0 }
 0x19d   : > { %285 = vst.msk [vmem:[%s188_s19] sm:$0xff] %vm205_vm0, %v279_v15  ;;  %v409_v16 = vpop.f32.mrb[1].mxu0 }
 0x19e   : > { %v282_v17 = vpop.f32.mrb[2].mxu0 }
 0x19f   : > { %485 = shalt.err (!%p482_p5)
}
 0x1a0   : > { %s486_s5 = scalar_lea.hbm %s651_s27, 128  ;;  %s490_s8 = scalar_lea.hbm %s702_s3, 256 }
 0x1a1   : > { %p487_p6 = scmp.ne.s32.totalorder %s651_s27, %s486_s5  ;;  %p491_p10 = scmp.lt.u32.totalorder %s651_s27, %s702_s3 }
 0x1a2   : > { %p492_p11 = scmp.lt.u32.totalorder %s490_s8, %s486_s5  ;;  %p494_p13 = scmp.lt.u32.totalorder %s486_s5, %s651_s27 }
 0x1a3   : > { %p488_p7 = pnand %p487_p6, %p615_p4 }
 0x1a4   : > { %p493_p12 = por %p492_p11, %p491_p10 }
 0x1a5   : > { %p489_p9 = pneg %p488_p7 }
 0x1a6   : > { %p495_p0 = por %p494_p13, %p493_p12 }
 0x1a8   : > { %p496_p1 = pnand %p495_p0, %p489_p9 }
 0x1aa   : > { %499 = shalt.err (!%p496_p1)
}
 0x1ab   : > { %411 = dma.vmem_to_hbm [thread:$0]  (%p615_p4), %s653_s21, 128, %s651_s27, %s287_s28   ;;  %v410_v18 = vpop.f32.mrb[3].mxu0 }
 0x1ac PF: > { %p417_p2 = scmp.ge.s32.totalorder %s550_s17, 2  ;;  %s313_s11 = sand.u32 1, %s530_s12  }
 0x1ad   : > { %s314_s18 = scalar_lea.sflag [#allocation4], %s313_s11 }
 0x1ae   : > { %p414_p3 = pnand %p417_p2, %p622_p8 }
 0x1b0   : > { %525 = dma.done.wait (!%p414_p3), %s314_s18, 128  }
 0x1b1   : > { %527 = vsyncadd (!%p414_p3), %s314_s18, 4294967168  ;;  %s16_s17 = sadd.s32 1, %s550_s17   ;;  %s705_s12 = smov %s534_s13 }
 0x1b2   : > { %p13_p5 = scmp.ge.s32.totalorder %s16_s17, 4   ;;  %s706_s13 = smov %s538_s14 }
 0x1b3   : > { %s707_s14 = smov %s628_s25  ;;  %s708_s15 = smov %s546_s16 }
 0x1b4   : > { %s709_s16 = smov %s711_s20  ;;  %15 = sbr.rel (!%p13_p5) target bundleno = 4 (0x4), region = 74 }
 0x1bb   :  { %319 = vsyncpa [#allocation4], 1 }
 0x1bc   :  { %321 = vsyncpa [#allocation4 + $0x1], 1 }

// kernel: transformer_forward.2
= control target key start
LH: loop header
LB: loop body
LE: loop exit
PB: predicated region body
PF: predicated region fallthrough
CT: control target
= control target key end

     0   :  { %s2340_s21 = smov 0   ;;  %s2342_s22 = smov 0   ;;  %s2630_s0 = inlined_call_operand.vmem [shape: f32[2,8,32], index: 0, kind: input, shape index: {}]   ;;  %s2631_s1 = inlined_call_operand.vmem [shape: f32[2,1,32], index: 1, kind: input, shape index: {}]   ;;  %s2632_s2 = inlined_call_operand.vmem [shape: bf16[2,32,32], index: 2, kind: input, shape index: {}]   ;;  %s2633_s3 = inlined_call_operand.vmem [shape: bf16[2,32,16], index: 3, kind: input, shape index: {}]   ;;  %s2634_s4 = inlined_call_operand.vmem [shape: bf16[2,32,16], index: 4, kind: input, shape index: {}]   ;;  %s2635_s5 = inlined_call_operand.vmem [shape: bf16[2,32,32], index: 5, kind: input, shape index: {}]   ;;  %s2636_s6 = inlined_call_operand.vmem [shape: f32[2,1,32], index: 6, kind: input, shape index: {}]   ;;  %s2637_s7 = inlined_call_operand.vmem [shape: bf16[2,32,128], index: 7, kind: input, shape index: {}]   ;;  %s2638_s8 = inlined_call_operand.vmem [shape: bf16[2,32,128], index: 8, kind: input, shape index: {}]   ;;  %s2639_s9 = inlined_call_operand.vmem [shape: bf16[2,128,32], index: 9, kind: input, shape index: {}]   ;;  %s2640_s10 = inlined_call_operand.vmem [shape: f32[8,8], index: 10, kind: input, shape index: {}]   ;;  %s2641_s11 = inlined_call_operand.vmem [shape: f32[8,8], index: 11, kind: input, shape index: {}]   ;;  %s2642_s12 = inlined_call_operand.vmem [shape: f32[2,8,32], index: 12, kind: output, shape index: {}]  }
   0x1   :  { %s2344_s23 = smov 0   ;;  %s2346_s24 = smov 0  }
   0x2   :  { %s2348_s25 = smov 0  }
   0x3 LB: > { %s31_s26 = sadd.s32 1, %s2258_s23  ;;  %s34_s27 = sadd.s32 1, %s2262_s24  ;;  %s2266_s25 = sphi %s2348_s25, %s22_s25   ;;  %s2262_s24 = sphi %s2346_s24, %s2648_s24   ;;  %s2258_s23 = sphi %s2344_s23, %s2647_s23   ;;  %s2254_s22 = sphi %s2342_s22, %s2646_s22   ;;  %s2250_s21 = sphi %s2340_s21, %s2645_s21  }
   0x4   : > { %p32_p0 = scmp.ge.s32.totalorder %s31_s26, 2  ;;  %p1914_p1 = scmp.ge.s32.totalorder %s2266_s25, 1 }
   0x5   : > { %p459_p2 = scmp.lt.s32.totalorder %s2266_s25, 5 }
   0x6   : > { %s2650_s26 = smov (%p32_p0, %s31_s26), 0  ;;  %s2652_s27 = smov (!%p32_p0, %s34_s27), %s2262_s24 }
   0x7   : > { %p460_p3 = pnand %p1914_p1, %p459_p2  ;;  %p36_p4 = scmp.ge.s32.totalorder %s2652_s27, 2 }
   0x8   : > { %p540_p5 = scmp.lt.s32.totalorder (!%p460_p3), %s2254_s22, 1  ;;  %vm593_vm0 = vcmask (!%p460_p3), 261120   ;;  %p544_p6 = scmp.lt.s32.totalorder (!%p460_p3), %s2250_s21, 1  ;;  %v2268_v3 = vmov (!%p460_p3), 0.0   ;;  %vm2269_vm1 = vmmov (!%p460_p3), 0   ;;  %v727_v6 = vlaneseq (!%p460_p3)  ;;  %v725_v37 = vld [vmem:[%s2640_s10] sm:$0xff] (!%p460_p3) }
   0x9   : > { %s2654_s27 = smov (%p36_p4, %s2652_s27), 0  ;;  %463 = sbr.rel (%p460_p3) target bundleno = 3199 (0xc7f), region = 68 }
   0xa   : > { %2025 = vmatprep.subr.bf16.mxu0 (!%p460_p3), %v2268_v3  ;;  %2029 = vmatprep.mubr.msk.bf16.mxu0 (!%p460_p3), %vm2269_vm1, %v2268_v3  ;;  %v2414_v7 = vshrl.u32 (!%p460_p3), %v727_v6, 7  ;;  %v2416_v8 = vand.u32 (!%p460_p3), 127, %v727_v6  ;;  %vm754_vm8 = vcmask (!%p460_p3), 64512   ;;  %s2270_s20 = smov (!%p460_p3), 120   ;;  %vm1143_vm9 = vcmask (!%p460_p3), 1043456   ;;  %v2474_v38 = vld [vmem:[%s2641_s11] sm:$0xff] (!%p460_p3) }
   0xb   : > { %2046 = vmatprep.subr.mxu1 (!%p460_p3), %v2268_v3  ;;  %2048 = vmatprep.mubr.msk.f32.mxu1 (!%p460_p3), %vm2269_vm1, %v2268_v3  ;;  %s2273_s19 = smov (!%p460_p3), 16   ;;  %vm1432_vm11 = vcmask (!%p460_p3), 130048   ;;  %vm1434_vm12 = vcmask (!%p460_p3), 195584  }
   0xc   : > { %v731_v9 = vadd.s32 (!%p460_p3), 1, %v2414_v7  ;;  %v737_v10 = vand.u32 (!%p460_p3), 1, %v2414_v7  ;;  %v1938_v11 = vadd.s32 (!%p460_p3), 4294967295, %v2414_v7  ;;  %vm974_vm10 = vcmp.gt.s32.totalorder (!%p460_p3), %v2416_v8, %v2414_v7 }
   0xe   : > { %vm732_vm2 = vcmp.eq.s32.totalorder (!%p460_p3), %v2416_v8, %v731_v9  ;;  %vm745_vm3 = vcmp.eq.s32.totalorder (!%p460_p3), %v737_v10, 0  ;;  %vm748_vm4 = vcmp.eq.s32.totalorder (!%p460_p3), %v2416_v8, %v1938_v11  ;;  %vm749_vm5 = vcmp.eq.s32.totalorder (!%p460_p3), %v737_v10, 1 }
   0xf   : > { %vm746_vm6 = vmand (!%p460_p3), %vm732_vm2, %vm745_vm3 }
  0x10   : > { %s2656_s22 = smov (!%p540_p5, %s2254_s22), 1  ;;  %s2658_s21 = smov (!%p544_p6, %s2250_s21), 1  ;;  %vm750_vm7 = vmand %vm748_vm4, %vm749_vm5 }
  0x11   : > { %s2643_s28 = sshll.u32 %s2656_s22, 3  ;;  %s2396_s14 = sshll.u32 %s2658_s21, 4  ;;  %v751_v12 = vsel %vm750_vm7, -1.0, %v2268_v3 }
  0x12   : > { %s543_s13 = scalar_lea.vmem %s2630_s0, %s2643_s28  ;;  %s1979_s15 = sshll.u32 %s2658_s21, 6  ;;  %v2424_v13 = vsel %vm746_vm6, 1.0, %v751_v12 }
  0x13   : > { %v2380_v0 = vld [vmem:[%s543_s13] sm:$0xff]  ;;  %s556_s18 = scalar_lea.vmem %s2633_s3, %s2396_s14  ;;  %s2406_s29 = scalar_lea.vmem %s2639_s9, %s1979_s15  ;;  %2047 = vmatpush3.msra.mxu1 %v2424_v13 }
  0x14   : > { %v592_v1 = vmul.f32 %v2380_v0, %v2380_v0  ;;  %v2184_v4 = vld [vmem:[%s556_s18] sm:$0xff]   ;;  %v2185_v5 = vld [vmem:[%s556_s18 + $0x8] sm:$0xff]   ;;  %s561_s28 = scalar_lea.vmem %s2634_s4, %s2396_s14  ;;  %2059 = vmatprep.subr.mxu1 %v2424_v13  ;;  %s546_s17 = scalar_lea.vmem %s2631_s1, %s2658_s21 }
  0x15   : > { %2026 = vmatpush3.bf16.msra.mxu0 %v2184_v4  ;;  %v1931_v18 = vld [vmem:[%s546_s17] ss:$0 sm:$0xff]  ;;  %v2187_v23 = vld [vmem:[%s561_s28 + $0x8] sm:$0xff]   ;;  %s2271_s17 = smov 112   ;;  %s2272_s18 = smov 8  }
  0x16   : > { %v594_v2 = vsel %vm593_vm0, %v592_v1, 0.0  ;;  %2027 = vmatprep.subr.bf16.mxu0 %v2268_v3  ;;  %v2186_v21 = vld [vmem:[%s561_s28] sm:$0xff]   ;;  %s551_s28 = scalar_lea.vmem %s2632_s2, %s2396_s14  ;;  %s566_s30 = scalar_lea.vmem %s2635_s5, %s2396_s14 }
  0x17   : > { %595 = vadd.xlane.f32.xlu0 %v594_v2  ;;  %v2188_v24 = vld [vmem:[%s551_s28] sm:$0xff]   ;;  %v2189_v28 = vld [vmem:[%s551_s28 + $0x8] sm:$0xff]   ;;  %v2510_v2 = vsel %vm974_vm10, -1e+30, %v2268_v3  ;;  %s2274_s13 = smov 24   ;;  %s579_s28 = scalar_lea.vmem %s2638_s8, %s2396_s14 }
  0x19   : > { %2028 = vmatpush3.bf16.msra.mxu0 %v2185_v5 }
  0x1a   : > { %2033 = vmatprep.subr.bf16.mxu0 %v2268_v3 }
  0xa4   : > { %v596_v14 = vpop.xlane.xlu0 %595 }
  0xa5   : > { %v598_v15 = vmul.f32 0.03125, %v596_v14 }
  0xa7   : > { %v599_v16 = vadd.f32 1e-05, %v598_v15 }
  0xa9   : > { %2204 = vrsqrt.f32 %v599_v16 }
  0xb3   : > { %v2205_v17 = vpop.eup %2204 }
  0xb4   : > { %v601_v19 = vmul.f32 %v2205_v17, %v2380_v0 }
  0xb6   : > { %v608_v20 = vmul.f32 %v1931_v18, %v601_v19 }
  0xb8   : > { %v609_v22 = vpack.c.bf16 %v608_v20, %v608_v20 }
  0xba   : > { %2030 = vmatmul.mubr.msk.bf16.vlgmr.msra.gmra.mrb[0].mxu0 %vm593_vm0, %v609_v22 }
  0xbb   : > { %2034 = vmatpush3.bf16.msra.mxu0 %v2186_v21  ;;  %2037 = vmatprep.mubr.msk.bf16.mxu0 %vm2269_vm1, %v2268_v3 }
  0xbc   : > { %2035 = vmatprep.subr.bf16.mxu0 %v2268_v3 }
  0xbf   : > { %2036 = vmatpush3.bf16.msra.mxu0 %v2187_v23 }
  0xc0   : > { %2041 = vmatprep.subr.mxu0 %v2268_v3 }
  0xc2   : > { %2038 = vmatmul.mubr.msk.bf16.vlgmr.msra.gmra.mrb[4].mxu0 %vm593_vm0, %v609_v22 }
  0xc3   : > { %2042 = vmatpush3.msra.mxu0 %v2424_v13  ;;  %2043 = vmatprep.mubr.msk.f32.mxu0 %vm2269_vm1, %v2268_v3 }
  0xc4   : > { %2051 = vmatprep.subr.bf16.mxu0 %v2268_v3 }
 0x18d   : > { %v2447_v25 = vpop.f32.mrb[0].mxu0 }
 0x18e   : > { %837 = vrot.lane.b32.xlu0 %v2447_v25, %s2270_s20  ;;  %v2031_v26 = vpop.f32.mrb[1].mxu0  ;;  %2044 = vmatmul.mubr.msk.f32.vlgmr.msra.gmra.mrb[8].mxu0 %vm754_vm8, %v2447_v25  ;;  %v753_v40 = vmul.f32 %v725_v37, %v2447_v25 }
 0x18f   : > { %2052 = vmatpush3.bf16.msra.mxu0 %v2188_v24  ;;  %v666_v27 = vpop.f32.mrb[2].mxu0  ;;  %2055 = vmatprep.mubr.msk.bf16.mxu0 %vm2269_vm1, %v2268_v3 }
 0x190   : > { %v2032_v29 = vpop.f32.mrb[3].mxu0  ;;  %2053 = vmatprep.subr.bf16.mxu0 %v2268_v3 }
 0x193   : > { %2054 = vmatpush3.bf16.msra.mxu0 %v2189_v28 }
 0x194   : > { %2070 = vmatprep.subr.bf16.mxu0 %v2268_v3 }
 0x195   : > { %v719_v30 = vpop.f32.mrb[4].mxu0 }
 0x196   : > { %v2457_v31 = vpack.c.bf16 %v719_v30, %v719_v30  ;;  %2056 = vmatmul.mubr.msk.bf16.vlgmr.msra.gmra.mrb[12].mxu0 %vm593_vm0, %v609_v22  ;;  %v2039_v32 = vpop.f32.mrb[5].mxu0 }
 0x197   : > { %v722_v33 = vpop.f32.mrb[6].mxu0  ;;  %2072 = vmatprep.mubr.msk.bf16.mxu0 %vm2269_vm1, %v2268_v3 }
 0x198   : > { %v1145_v34 = vsel %vm1143_vm9, %v2457_v31, 0  ;;  %v2040_v35 = vpop.f32.mrb[7].mxu0 }
 0x199   : > { %2071 = vmatpush3.bf16.msra.mxu0 %v1145_v34 }
 0x19a   : > { %2081 = vmatprep.subr.bf16.mxu0 %v2268_v3 }
 0x200   : > { %v838_v36 = vpop.permute.xlu0 %837 }
 0x201   : > { %2049 = vmatmul.mubr.msk.f32.vlgmr.msra.gmra.mrb[0].mxu1 %vm754_vm8, %v838_v36 }
 0x202   : > { %2060 = vmatpush3.msra.mxu1 %v2424_v13 }
 0x203   : > { %2064 = vmatprep.subr.bf16.mxu1 %v2268_v3 }
 0x261   : > { %v824_v39 = vpop.f32.mrb[8].mxu0 }
 0x262   : > { %v828_v41 = vmul.f32 %v824_v39, %v2474_v38  ;;  %v2045_v42 = vpop.f32.mrb[9].mxu0 }
 0x264   : > { %v829_v43 = vadd.f32 %v828_v41, %v753_v40 }
 0x266   : > { %v830_v50 = vpack.c.bf16 %v829_v43, %v829_v43 }
 0x268   : > { %v1070_v52 = vsel %vm754_vm8, %v830_v50, 0 }
 0x269   : > { %v2478_v44 = vpop.f32.mrb[12].mxu0 }
 0x26a   : > { %977 = vrot.lane.b32.xlu1 %v2478_v44, %s2270_s20  ;;  %v2057_v45 = vpop.f32.mrb[13].mxu0  ;;  %2061 = vmatprep.mubr.msk.f32.mxu1 %vm754_vm8, %v2478_v44  ;;  %v980_v57 = vmul.f32 %v2478_v44, %v725_v37 }
 0x26b   : > { %v971_v46 = vpop.f32.mrb[14].mxu0 }
 0x26c   : > { %v2058_v47 = vpop.f32.mrb[15].mxu0 }
 0x26e   : > { %1193 = vrot.lane.b32.xlu1 %v2478_v44, %s2271_s17 }
 0x2d4   : > { %v907_v48 = vpop.f32.mrb[0].mxu1 }
 0x2d5   : > { %v2050_v49 = vpop.f32.mrb[1].mxu1  ;;  %v911_v15 = vmul.f32 %v907_v48, %v2474_v38 }
 0x2dc   : > { %v2486_v51 = vpop.permute.xlu1 %977 }
 0x2dd   : > { %1195 = vrot.lane.b32.xlu1 %v2486_v51, %s2271_s17  ;;  %2062 = vmatmul.mubr.msk.f32.vlgmr.msra.gmra.mrb[2].mxu1 %vm754_vm8, %v2486_v51  ;;  %v981_v54 = vmul.f32 %v2486_v51, %v725_v37 }
 0x2de   : > { %2065 = vmatpush3.bf16.xpose.msra.mxu1 %v1070_v52  ;;  %2066 = vmatprep.mubr.msk.bf16.mxu1 %vm2269_vm1, %v2268_v3 }
 0x2df   : > { %2076 = vmatprep.subr.mxu1 %v2424_v13 }
 0x2e0   : > { %v1194_v62 = vpop.permute.xlu1 %1193 }
 0x34f   : > { %v1196_v63 = vpop.permute.xlu1 %1195 }
 0x3b0   : > { %v2063_v53 = vpop.f32.mrb[2].mxu1 }
 0x3b1   : > { %v1062_v55 = vmul.f32 %v2063_v53, %v2474_v38  ;;  %v1052_v56 = vpop.f32.mrb[3].mxu1 }
 0x3b2   : > { %v1061_v58 = vmul.f32 %v1052_v56, %v2474_v38 }
 0x3b3   : > { %v1064_v59 = vadd.f32 %v1062_v55, %v981_v54 }
 0x3b4   : > { %v1063_v60 = vadd.f32 %v1061_v58, %v980_v57 }
 0x3b6   : > { %v1065_v61 = vpack.c.bf16 %v1064_v59, %v1063_v60 }
 0x3b8   : > { %2067 = vmatmul.mubr.msk.bf16.vlgmr.msra.gmra.mrb[4].mxu1 %vm754_vm8, %v1065_v61 }
 0x3b9   : > { %2078 = vmatprep.mubr.msk.f32.mxu1 %vm754_vm8, %v1194_v62  ;;  %2077 = vmatpush3.msra.mxu1 %v2424_v13 }
 0x3ba   : > { %2087 = vmatprep.subr.bf16.mxu1 %v2268_v3 }
 0x3c0   : > { %2079 = vmatmul.mubr.msk.f32.vlgmr.msra.gmra.mrb[8].mxu1 %vm754_vm8, %v1196_v63 }
 0x3c1   : > { %2089 = vmatprep.mubr.msk.bf16.mxu1 %vm2269_vm1, %v2268_v3 }
 0x48b   : > { %v1106_v1 = vpop.f32.mrb[4].mxu1 }
 0x48c   : > { %v1113_v4 = vmul.f32 0.35355338, %v1106_v1  ;;  %v2068_v5 = vpop.f32.mrb[5].mxu1 }
 0x48d   : > { %v1109_v6 = vpop.f32.mrb[6].mxu1 }
 0x48e   : > { %v1114_v9 = vmul.f32 0.35355338, %v1109_v6  ;;  %v2069_v10 = vpop.f32.mrb[7].mxu1  ;;  %v1115_v11 = vadd.f32 %v1113_v4, %v2510_v2 }
 0x490   : > { %v1117_v12 = vsel %vm754_vm8, %v1115_v11, -inf  ;;  %v1116_v13 = vadd.f32 %v1114_v9, %v2510_v2 }
 0x491   : > { %1118 = vmax.xlane.f32.xlu1 %v1117_v12 }
 0x492   : > { %v1120_v14 = vsel %vm754_vm8, %v1116_v13, -inf }
 0x493   : > { %1121 = vmax.xlane.f32.xlu0 %v1120_v14  ;;  %v2080_v7 = vpop.f32.mrb[8].mxu1 }
 0x494   : > { %v1267_v8 = vpop.f32.mrb[9].mxu1  ;;  %v1277_v17 = vmul.f32 %v2080_v7, %v2474_v38 }
 0x495   : > { %v1276_v16 = vmul.f32 %v1267_v8, %v2474_v38 }
 0x4a2   : > { %833 = vrot.lane.b32.xlu1 %v725_v37, %s2272_s18 }
 0x4a6   : > { %1188 = vrot.lane.b32.xlu1 %v725_v37, %s2273_s19 }
 0x4a9   : > { %913 = vrot.lane.b32.xlu0 %v911_v15, %s2272_s18 }
 0x4aa   : > { %1280 = vrot.lane.b32.xlu1 %v1276_v16, %s2273_s19 }
 0x4ae   : > { %1282 = vrot.lane.b32.xlu1 %v1277_v17, %s2273_s19 }
 0x51e   : > { %v1119_v18 = vpop.xlane.xlu1 %1118 }
 0x51f   : > { %v1123_v19 = vsub.f32 %v1115_v11, %v1119_v18 }
 0x520   : > { %v1122_v20 = vpop.xlane.xlu0 %1121 }
 0x521   : > { %v1125_v21 = vmul.f32 1.442695, %v1123_v19  ;;  %v1124_v22 = vsub.f32 %v1116_v13, %v1122_v20 }
 0x522   : > { %v834_v24 = vpop.permute.xlu1 %833 }
 0x523   : > { %2206 = vpow2.f32 %v1125_v21  ;;  %v1127_v23 = vmul.f32 1.442695, %v1124_v22  ;;  %v836_v38 = vmul.f32 %v834_v24, %v2447_v25 }
 0x524   : > { %v914_v39 = vpop.permute.xlu0 %913 }
 0x525   : > { %2208 = vpow2.f32 %v1127_v23  ;;  %v916_v41 = vadd.f32 %v914_v39, %v836_v38  ;;  %v2191_v23 = vld [vmem:[%s566_s30 + $0x8] sm:$0xff]  }
 0x526   : > { %v1189_v26 = vpop.permute.xlu1 %1188 }
 0x527   : > { %v1192_v34 = vmul.f32 %v1189_v26, %v2486_v51  ;;  %v1191_v35 = vmul.f32 %v1189_v26, %v2478_v44  ;;  %v917_v42 = vpack.c.bf16 %v916_v41, %v916_v41 }
 0x52a   : > { %v1281_v32 = vpop.permute.xlu1 %1280 }
 0x52b   : > { %v1286_v37 = vadd.f32 %v1281_v32, %v1191_v35 }
 0x52d   : > { %v2207_v27 = vpop.eup %2206 }
 0x52e   : > { %v1129_v28 = vsel %vm754_vm8, %v2207_v27, 0.0  ;;  %v1283_v33 = vpop.permute.xlu1 %1282 }
 0x52f   : > { %v2209_v29 = vpop.eup %2208  ;;  %1130 = vadd.xlane.f32.xlu1 %v1129_v28  ;;  %v1287_v36 = vadd.f32 %v1283_v33, %v1192_v34 }
 0x530   : > { %v1132_v30 = vsel %vm754_vm8, %v2209_v29, 0.0 }
 0x531   : > { %1133 = vadd.xlane.f32.xlu0 %v1132_v30  ;;  %v1288_v40 = vpack.c.bf16 %v1287_v36, %v1286_v37 }
 0x540   : > { %1290 = vrot.lane.b32.xlu1 %v1288_v40, %s2271_s17  ;;  %s574_s17 = scalar_lea.vmem %s2637_s7, %s2396_s14 }
 0x547   : > { %1293 = vrot.lane.b32.xlu0 %v917_v42, %s2270_s20 }
 0x5bc   : > { %v1131_v43 = vpop.xlane.xlu1 %1130 }
 0x5bd   : > { %2210 = vrcp.f32 %v1131_v43 }
 0x5be   : > { %v1134_v45 = vpop.xlane.xlu0 %1133 }
 0x5bf   : > { %2212 = vrcp.f32 %v1134_v45  ;;  %v2193_v45 = vld [vmem:[%s579_s28] sm:$0xff]  }
 0x5c0   : > { %v1291_v51 = vpop.permute.xlu1 %1290 }
 0x5c2   : > { %v1294_v49 = vpop.permute.xlu0 %1293 }
 0x5c3   : > { %v1299_v25 = vsel %vm754_vm8, %v1294_v49, 0 }
 0x5c7   : > { %v2211_v46 = vpop.eup %2210 }
 0x5c8   : > { %v1137_v48 = vmul.f32 %v2211_v46, %v2207_v27  ;;  %v2194_v46 = vld [vmem:[%s574_s17 + $0x8] sm:$0xff]  }
 0x5c9   : > { %v2213_v47 = vpop.eup %2212 }
 0x5ca   : > { %v1138_v44 = vmul.f32 %v2213_v47, %v2209_v29  ;;  %v2195_v47 = vld [vmem:[%s579_s28 + $0x8] sm:$0xff]  }
 0x5cc   : > { %v1139_v50 = vpack.c.bf16 %v1138_v44, %v1137_v48 }
 0x5ce   : > { %2073 = vmatmul.mubr.msk.bf16.vlgmr.msra.gmra.mrb[16].mxu0 %vm754_vm8, %v1139_v50 }
 0x5cf   : > { %2082 = vmatpush3.bf16.xpose.msra.mxu0 %v1299_v25  ;;  %2083 = vmatprep.mubr.msk.bf16.mxu0 %vm2269_vm1, %v2268_v3 }
 0x5d0   : > { %2093 = vmatprep.subr.bf16.mxu0 %v2268_v3 }
 0x5d6   : > { %2084 = vmatmul.mubr.msk.bf16.vlgmr.msra.gmra.mrb[20].mxu0 %vm754_vm8, %v1291_v51 }
 0x5d7   : > { %2097 = vmatprep.mubr.msk.bf16.mxu0 %vm2269_vm1, %v2268_v3 }
 0x6a1   : > { %v2539_v52 = vpop.f32.mrb[16].mxu0 }
 0x6a2   : > { %v2074_v53 = vpop.f32.mrb[17].mxu0 }
 0x6a3   : > { %v1184_v54 = vpop.f32.mrb[18].mxu0 }
 0x6a4   : > { %v2075_v55 = vpop.f32.mrb[19].mxu0 }
 0x6a5   : > { %v2197_v55 = vld [vmem:[%s2406_s29 + $0x8] sm:$0xff]  }
 0x6a9   : > { %v1335_v56 = vpop.f32.mrb[20].mxu0 }
 0x6aa   : > { %v1342_v57 = vmul.f32 0.35355338, %v1335_v56  ;;  %v2085_v58 = vpop.f32.mrb[21].mxu0  ;;  %v2198_v56 = vld [vmem:[%s2406_s29 + $0x10] sm:$0xff]  }
 0x6ab   : > { %v1338_v59 = vpop.f32.mrb[22].mxu0  ;;  %v2200_v58 = vld [vmem:[%s2406_s29 + $0x20] sm:$0xff]  }
 0x6ac   : > { %v1343_v60 = vmul.f32 0.35355338, %v1338_v59  ;;  %v2086_v61 = vpop.f32.mrb[23].mxu0  ;;  %v1344_v62 = vadd.f32 %v1342_v57, %v2510_v2  ;;  %v2199_v57 = vld [vmem:[%s2406_s29 + $0x18] sm:$0xff]   ;;  %v2201_v59 = vld [vmem:[%s2406_s29 + $0x28] sm:$0xff]  }
 0x6ad   : > { %v2203_v61 = vld [vmem:[%s2406_s29 + $0x38] sm:$0xff]  }
 0x6ae   : > { %v1346_v63 = vsel %vm754_vm8, %v1344_v62, -inf  ;;  %v1345_v1 = vadd.f32 %v1343_v60, %v2510_v2  ;;  %v2202_v60 = vld [vmem:[%s2406_s29 + $0x30] sm:$0xff]  }
 0x6af   : > { %1347 = vmax.xlane.f32.xlu1 %v1346_v63 }
 0x6b0   : > { %v1349_v4 = vsel %vm754_vm8, %v1345_v1, -inf }
 0x6b1   : > { %1350 = vmax.xlane.f32.xlu0 %v1349_v4 }
 0x73c   : > { %v1348_v5 = vpop.xlane.xlu1 %1347 }
 0x73d   : > { %v1352_v6 = vsub.f32 %v1344_v62, %v1348_v5 }
 0x73e   : > { %v1351_v9 = vpop.xlane.xlu0 %1350 }
 0x73f   : > { %v1354_v10 = vmul.f32 1.442695, %v1352_v6  ;;  %v1353_v11 = vsub.f32 %v1345_v1, %v1351_v9 }
 0x741   : > { %2214 = vpow2.f32 %v1354_v10  ;;  %v1356_v12 = vmul.f32 1.442695, %v1353_v11 }
 0x743   : > { %2216 = vpow2.f32 %v1356_v12 }
 0x74b   : > { %v2215_v13 = vpop.eup %2214 }
 0x74c   : > { %v1358_v14 = vsel %vm754_vm8, %v2215_v13, 0.0 }
 0x74d   : > { %v2217_v7 = vpop.eup %2216  ;;  %1359 = vadd.xlane.f32.xlu0 %v1358_v14 }
 0x74e   : > { %v1361_v8 = vsel %vm754_vm8, %v2217_v7, 0.0 }
 0x74f   : > { %1362 = vadd.xlane.f32.xlu1 %v1361_v8 }
 0x760   : > { %1420 = vrot.lane.b32.xlu1 %v1184_v54, %s2272_s18  ;;  %v2196_v54 = vld [vmem:[%s2406_s29] sm:$0xff]  }
 0x763   : > { %1370 = vrot.lane.b32.xlu0 %v2457_v31, %s2270_s20  ;;  %v2190_v31 = vld [vmem:[%s566_s30] sm:$0xff]   ;;  %s569_s30 = scalar_lea.vmem %s2636_s6, %s2658_s21  ;;  %s2644_s21 = sshll.u32 %s2656_s22, 3 }
 0x764   : > { %2094 = vmatpush3.bf16.msra.mxu0 %v2190_v31  ;;  %v1955_v25 = vld [vmem:[%s569_s30] ss:$0 sm:$0xff]  ;;  %s588_s15 = scalar_lea.vmem %s2642_s12, %s2644_s21 }
 0x765   : > { %2095 = vmatprep.subr.bf16.mxu0 %v2268_v3 }
 0x768   : > { %2096 = vmatpush3.bf16.msra.mxu0 %v2191_v23 }
 0x769   : > { %2109 = vmatprep.subr.bf16.mxu0 %v2268_v3 }
 0x7da   : > { %v1360_v2 = vpop.xlane.xlu0 %1359 }
 0x7db   : > { %2218 = vrcp.f32 %v1360_v2 }
 0x7dc   : > { %v1363_v15 = vpop.xlane.xlu1 %1362 }
 0x7dd   : > { %2220 = vrcp.f32 %v1363_v15 }
 0x7de   : > { %v1371_v16 = vpop.permute.xlu0 %1370 }
 0x7df   : > { %v1376_v17 = vsel %vm1143_vm9, %v1371_v16, 0 }
 0x7e0   : > { %2088 = vmatpush3.bf16.msra.mxu1 %v1376_v17  ;;  %v1421_v29 = vpop.permute.xlu1 %1420 }
 0x7e1   : > { %2101 = vmatprep.subr.bf16.mxu1 %v2268_v3  ;;  %v1431_v30 = vsel %vm754_vm8, %v2539_v52, %v1421_v29 }
 0x7e5   : > { %v2219_v18 = vpop.eup %2218 }
 0x7e6   : > { %v1366_v20 = vmul.f32 %v2219_v18, %v2215_v13 }
 0x7e7   : > { %v2221_v19 = vpop.eup %2220 }
 0x7e8   : > { %v1367_v21 = vmul.f32 %v2221_v19, %v2217_v7 }
 0x7ea   : > { %v1368_v22 = vpack.c.bf16 %v1367_v21, %v1366_v20 }
 0x7ec   : > { %2090 = vmatmul.mubr.msk.bf16.vlgmr.msra.gmra.mrb[12].mxu1 %vm754_vm8, %v1368_v22 }
 0x7ed   : > { %2105 = vmatprep.mubr.msk.bf16.mxu1 %vm2269_vm1, %v2268_v3 }
 0x8bf   : > { %v1412_v24 = vpop.f32.mrb[12].mxu1 }
 0x8c0   : > { %1424 = vrot.lane.b32.xlu1 %v1412_v24, %s2273_s19  ;;  %v2091_v26 = vpop.f32.mrb[13].mxu1 }
 0x8c1   : > { %v1415_v27 = vpop.f32.mrb[14].mxu1 }
 0x8c2   : > { %1428 = vrot.lane.b32.xlu0 %v1415_v27, %s2274_s13  ;;  %v2092_v28 = vpop.f32.mrb[15].mxu1 }
 0x932   : > { %v1425_v32 = vpop.permute.xlu1 %1424 }
 0x933   : > { %v1433_v33 = vsel %vm1432_vm11, %v1431_v30, %v1425_v32 }
 0x934   : > { %v1429_v34 = vpop.permute.xlu0 %1428 }
 0x935   : > { %v1435_v35 = vsel %vm1434_vm12, %v1433_v33, %v1429_v34 }
 0x936   : > { %v1436_v36 = vpack.c.bf16 %v1435_v35, %v1435_v35 }
 0x938   : > { %2098 = vmatmul.mubr.msk.bf16.vlgmr.msra.gmra.mrb[24].mxu0 %vm593_vm0, %v1436_v36 }
 0x939   : > { %2113 = vmatprep.mubr.msk.bf16.mxu0 %vm2269_vm1, %v2268_v3  ;;  %2110 = vmatpush3.bf16.msra.mxu0 %v2193_v45 }
 0x93a   : > { %2111 = vmatprep.subr.bf16.mxu0 %v2268_v3 }
 0x93d   : > { %2112 = vmatpush3.bf16.msra.mxu0 %v2195_v47 }
 0xa0b   : > { %v1490_v37 = vpop.f32.mrb[24].mxu0 }
 0xa0c   : > { %v2568_v38 = vadd.f32 %v1490_v37, %v2380_v0  ;;  %v2099_v39 = vpop.f32.mrb[25].mxu0  ;;  %v2192_v0 = vld [vmem:[%s574_s17] sm:$0xff]  }
 0xa0d   : > { %v1493_v40 = vpop.f32.mrb[26].mxu0  ;;  %2102 = vmatpush3.bf16.msra.mxu1 %v2192_v0 }
 0xa0e   : > { %v2100_v41 = vpop.f32.mrb[27].mxu0  ;;  %v1498_v42 = vmul.f32 %v2568_v38, %v2568_v38  ;;  %2103 = vmatprep.subr.bf16.mxu1 %v2268_v3 }
 0xa10   : > { %v1499_v43 = vsel %vm593_vm0, %v1498_v42, 0.0 }
 0xa11   : > { %1500 = vadd.xlane.f32.xlu1 %v1499_v43  ;;  %2104 = vmatpush3.bf16.msra.mxu1 %v2194_v46 }
 0xa12   : > { %2117 = vmatprep.subr.bf16.mxu1 %v2268_v3 }
 0xa9e   : > { %v1501_v48 = vpop.xlane.xlu1 %1500 }
 0xa9f   : > { %v1502_v44 = vmul.f32 0.03125, %v1501_v48 }
 0xaa1   : > { %v1503_v49 = vadd.f32 1e-05, %v1502_v44 }
 0xaa3   : > { %2222 = vrsqrt.f32 %v1503_v49 }
 0xaad   : > { %v2223_v50 = vpop.eup %2222 }
 0xaae   : > { %v1505_v51 = vmul.f32 %v2223_v50, %v2568_v38 }
 0xab0   : > { %v1512_v52 = vmul.f32 %v1955_v25, %v1505_v51 }
 0xab2   : > { %v1513_v53 = vpack.c.bf16 %v1512_v52, %v1512_v52 }
 0xab4   : > { %2106 = vmatmul.mubr.msk.bf16.vlgmr.msra.gmra.mrb[16].mxu1 %vm593_vm0, %v1513_v53  ;;  %2114 = vmatmul.mubr.msk.bf16.vlgmr.msra.gmra.mrb[28].mxu0 %vm593_vm0, %v1513_v53 }
 0xab5   : > { %2133 = vmatprep.mubr.msk.bf16.mxu1 %vm2269_vm1, %v2268_v3  ;;  %2118 = vmatpush3.bf16.msra.mxu1 %v2196_v54 }
 0xab6   : > { %2119 = vmatprep.subr.bf16.mxu1 %v2268_v3 }
 0xab9   : > { %2120 = vmatpush3.bf16.msra.mxu1 %v2197_v55 }
 0xaba   : > { %2121 = vmatprep.subr.bf16.mxu1 %v2268_v3 }
 0xabd   : > { %2122 = vmatpush3.bf16.msra.mxu1 %v2198_v56 }
 0xabe   : > { %2123 = vmatprep.subr.bf16.mxu1 %v2268_v3 }
 0xac1   : > { %2124 = vmatpush3.bf16.msra.mxu1 %v2199_v57 }
 0xac2   : > { %2125 = vmatprep.subr.bf16.mxu1 %v2268_v3 }
 0xac5   : > { %2126 = vmatpush3.bf16.msra.mxu1 %v2200_v58 }
 0xac6   : > { %2127 = vmatprep.subr.bf16.mxu1 %v2268_v3 }
 0xac9   : > { %2128 = vmatpush3.bf16.msra.mxu1 %v2201_v59 }
 0xaca   : > { %2129 = vmatprep.subr.bf16.mxu1 %v2268_v3 }
 0xacd   : > { %2130 = vmatpush3.bf16.msra.mxu1 %v2202_v60 }
 0xace   : > { %2131 = vmatprep.subr.bf16.mxu1 %v2268_v3 }
 0xad1   : > { %2132 = vmatpush3.bf16.msra.mxu1 %v2203_v61 }
 0xb87   : > { %v1567_v62 = vpop.f32.mrb[16].mxu1  ;;  %v1623_v63 = vpop.f32.mrb[28].mxu0 }
 0xb88   : > { %v1962_v1 = vmul.f32 -1.442695, %v1567_v62  ;;  %v2107_v4 = vpop.f32.mrb[17].mxu1  ;;  %v2115_v5 = vpop.f32.mrb[29].mxu0 }
 0xb89   : > { %v1570_v6 = vpop.f32.mrb[18].mxu1  ;;  %v1626_v9 = vpop.f32.mrb[30].mxu0 }
 0xb8a   : > { %2224 = vpow2.f32 %v1962_v1  ;;  %v2108_v10 = vpop.f32.mrb[19].mxu1  ;;  %v2116_v11 = vpop.f32.mrb[31].mxu0 }
 0xb94   : > { %v2225_v12 = vpop.eup %2224 }
 0xb95   : > { %v1632_v13 = vadd.f32 1.0, %v2225_v12 }
 0xb97   : > { %2226 = vrcp.f32 %v1632_v13 }
 0xba1   : > { %v2227_v14 = vpop.eup %2226 }
 0xba2   : > { %v1635_v7 = vmul.f32 %v2227_v14, %v1567_v62 }
 0xba4   : > { %v1636_v8 = vmul.f32 %v1635_v7, %v1623_v63 }
 0xba6   : > { %v1637_v3 = vpack.c.bf16 %v1636_v8, %v1636_v8 }
 0xba8   : > { %2134 = vmatmul.mubr.bf16.vlgmr.msra.gmra.mrb[20].mxu1 %v1637_v3 }
 0xc7b   : > { %v1736_v2 = vpop.f32.mrb[20].mxu1 }
 0xc7c   : > { %v1742_v15 = vadd.f32 %v1736_v2, %v2568_v38  ;;  %v2135_v16 = vpop.f32.mrb[21].mxu1 }
 0xc7d   : > { %v1739_v17 = vpop.f32.mrb[22].mxu1 }
 0xc7e   : > { %1743 = vst.msk [vmem:[%s588_s15] sm:$0xff] %vm593_vm0, %v1742_v15  ;;  %v2136_v18 = vpop.f32.mrb[23].mxu1 }
 0xc7f PF: > { %s22_s25 = sadd.s32 1, %s2266_s25   ;;  %s2645_s21 = smov %s2258_s23 }
 0xc80   : > { %p19_p7 = scmp.ge.s32.totalorder %s22_s25, 6   ;;  %s2646_s22 = smov %s2262_s24 }
 0xc81   : > { %s2647_s23 = smov %s2650_s26  ;;  %s2648_s24 = smov %s2654_s27 }
 0xc82   :  { %21 = sbr.rel (!%p19_p7) target bundleno = 3 (0x3), region = 125 }

</bundles_post_ra>
